<compile_context>
chip_gen: v5e
topology: v5e:2x2
jax: 0.10.0
libtpu: 0.0.40
codegen_flags: <defaults>
</compile_context>

<pallas_src>
import math

import jax
import jax.numpy as jnp
from jax import lax
from jax.experimental import pallas as pl
from jax.experimental.pallas import tpu as pltpu

# ---------------- config ----------------
B, S = 2, 8             # batch, sequence length
T = B * S               # tokens (batch folded into sublanes)
H = 32                  # hidden size
NH = 4                  # attention heads
DH = H // NH            # head dim
FF = 64                 # intermediate (FFN) size
NUM_LAYERS = 2
NUM_CLASSES = 2
VOCAB = 128
MAX_POS = 16
LN_EPS = 1e-12
LANES = 128             # lane-dense padded logits width

W_COLS = 3 * H          # 96: lane width of the packed per-layer weight slab
W_ROWS = 3 * H + FF     # 160: wqkv(H) + wo(H) + wi(H) + w2(FF) rows


# ---------------- in-kernel helpers ----------------
def _layernorm(x, gamma, beta):
    mu = jnp.mean(x, axis=-1, keepdims=True)
    var = jnp.mean((x - mu) ** 2, axis=-1, keepdims=True)
    return (x - mu) * lax.rsqrt(var + LN_EPS) * gamma + beta


def _gelu(x):
    # TODO(synk): BERT's default GELU is erf-based; tanh approximation used here.
    return 0.5 * x * (1.0 + jnp.tanh(0.7978845608028654 * (x + 0.044715 * x * x * x)))


def _dot(a_f32, w_bf16):
    # MXU-friendly: bf16 operands (weights pre-cast at load time), f32 accumulation.
    return jnp.dot(a_f32.astype(jnp.bfloat16), w_bf16,
                   preferred_element_type=jnp.float32)


# ---------------- fused kernel ----------------
def bert_fused_kernel(emb_ref, bias_ref, wl_ref, vl_ref, wh_ref, vg_ref, o_ref):
    # wl_ref : (L, 160, 96) bf16  packed per-layer matmul weights, (in, out) layout
    # vl_ref : (L,   8, 96) f32   packed per-layer bias / LayerNorm vectors
    # wh_ref : (H, H+128)   bf16  pooler W | classifier W (lane-padded)
    # vg_ref : (4, 128)     f32   emb_ln_g | emb_ln_b | pooler_b | cls_b (lane-padded)

    # Embedding LayerNorm (embedding dropout is identity in eval mode).
    x = _layernorm(emb_ref[...], vg_ref[0:1, 0:H], vg_ref[1:2, 0:H])    # (T, H) f32
    bias = bias_ref[...]                                                # (T, T) additive mask
    scale = 1.0 / math.sqrt(DH)

    for l in range(NUM_LAYERS):                 # static unroll over layers
        # --- packed per-layer weights (static slices of one ref; zero transposes) ---
        wqkv = wl_ref[l, 0:H, :]                                # (H, 3H) bf16
        wo = wl_ref[l, H:2 * H, 0:H]                            # (H, H)  bf16
        wi = wl_ref[l, 2 * H:3 * H, 0:FF]                       # (H, FF) bf16
        w2 = wl_ref[l, 3 * H:3 * H + FF, 0:H]                   # (FF, H) bf16

        bqkv = vl_ref[l, 0:1, :]                                # (1, 3H)
        bo = vl_ref[l, 1:2, 0:H]
        ln1_g = vl_ref[l, 2:3, 0:H]
        ln1_b = vl_ref[l, 3:4, 0:H]
        bi = vl_ref[l, 4:5, 0:FF]
        b2 = vl_ref[l, 5:6, 0:H]
        ln2_g = vl_ref[l, 6:7, 0:H]
        ln2_b = vl_ref[l, 7:8, 0:H]

        # Fused QKV projection: one MXU push; single bf16 cast of activations per layer.
        qkv_f32 = _dot(x, wqkv) + bqkv                          # (T, 3H) f32
        qkv = qkv_f32.astype(jnp.bfloat16)                      # one cast reused by all heads

        ctx_heads = []
        for h in range(NH):                     # static unroll over heads
            q_h = qkv[:, h * DH:(h + 1) * DH]                   # (T, DH) bf16
            k_h = qkv[:, H + h * DH:H + (h + 1) * DH]
            v_h = qkv[:, 2 * H + h * DH:2 * H + (h + 1) * DH]

            # q @ k^T without materializing a transpose (contract dim 1 of both).
            scores = lax.dot_general(q_h, k_h, (((1,), (1,)), ((), ())),
                                     preferred_element_type=jnp.float32)
            scores = scores * scale + bias                      # batched over B via mask
            scores = scores - jnp.max(scores, axis=-1, keepdims=True)
            p = jnp.exp(scores)
            p = p * pl.reciprocal(jnp.sum(p, axis=-1, keepdims=True), approx=True)

            ctx_heads.append(jnp.dot(p.astype(jnp.bfloat16), v_h,
                                     preferred_element_type=jnp.float32))  # (T, DH) f32

        # One (T,H)@(H,H) output projection instead of 4 tiny K=8 dots.
        # TODO(synk): optional further step — block-diagonal K/V layout to fuse all
        # heads' score/context matmuls into 2 dots — not implemented.
        ctx_all = jnp.concatenate(ctx_heads, axis=-1)           # (T, H) f32
        attn = _dot(ctx_all, wo)                                # (T, H) f32

        h1 = _layernorm(attn + bo + x, ln1_g, ln1_b)

        inter = _gelu(_dot(h1, wi) + bi)                        # (T, FF)
        ffn = _dot(inter, w2) + b2                              # (T, H)
        x = _layernorm(ffn + h1, ln2_g, ln2_b)

    # Pooler (dense + tanh). Computed for all token rows (trivially cheap at this
    # size, keeps stores full-tile & lane-dense); CLS rows are selected outside.
    pooled = jnp.tanh(_dot(x, wh_ref[:, 0:H]) + vg_ref[2:3, 0:H])        # (T, H)
    # nn.Dropout(p=0.3) is identity in eval mode.
    # TODO(synk): training-mode dropout (pltpu.prng_random_bits mask) not implemented.
    o_ref[...] = _dot(pooled, wh_ref[:, H:H + LANES]) + vg_ref[3:4, :]   # (T, 128)


# ---------------- parameter init (deterministic, PyTorch-style (out, in)) ----------------
def init_params(key):
    keys = iter(jax.random.split(key, 64))

    def dense(out_f, in_f):
        return 0.02 * jax.random.normal(next(keys), (out_f, in_f), jnp.float32)

    params = {
        "word_emb": 0.02 * jax.random.normal(next(keys), (VOCAB, H), jnp.float32),
        "pos_emb": 0.02 * jax.random.normal(next(keys), (MAX_POS, H), jnp.float32),
        "type_emb": 0.02 * jax.random.normal(next(keys), (2, H), jnp.float32),
        "emb_ln_g": jnp.ones((1, H), jnp.float32),
        "emb_ln_b": jnp.zeros((1, H), jnp.float32),
        "layers": [],
        "pooler_w": dense(H, H),
        "pooler_b": jnp.zeros((1, H), jnp.float32),
        "cls_w": dense(NUM_CLASSES, H),
        "cls_b": jnp.zeros((1, NUM_CLASSES), jnp.float32),
    }
    for _ in range(NUM_LAYERS):
        params["layers"].append({
            "wq": dense(H, H), "bq": jnp.zeros((1, H), jnp.float32),
            "wk": dense(H, H), "bk": jnp.zeros((1, H), jnp.float32),
            "wv": dense(H, H), "bv": jnp.zeros((1, H), jnp.float32),
            "wo": dense(H, H), "bo": jnp.zeros((1, H), jnp.float32),
            "ln1_g": jnp.ones((1, H), jnp.float32),
            "ln1_b": jnp.zeros((1, H), jnp.float32),
            "wi": dense(FF, H), "bi": jnp.zeros((1, FF), jnp.float32),
            "w2": dense(H, FF), "b2": jnp.zeros((1, H), jnp.float32),
            "ln2_g": jnp.ones((1, H), jnp.float32),
            "ln2_b": jnp.zeros((1, H), jnp.float32),
        })
    return params


# -------- one-time (model-load) weight prep: transpose / pack / pad / cast to bf16 --------
def prepare_kernel_params(p):
    def pad_lanes(a, width):
        return jnp.pad(a, ((0, 0), (0, width - a.shape[1])))

    wl, vl = [], []
    for l in p["layers"]:
        wqkv = jnp.concatenate([l["wq"], l["wk"], l["wv"]], axis=0).T   # (H, 3H) (in,out)
        wl.append(jnp.concatenate([
            wqkv,                                                       # rows [0, H)
            pad_lanes(l["wo"].T, W_COLS),                               # rows [H, 2H)
            pad_lanes(l["wi"].T, W_COLS),                               # rows [2H, 3H)
            pad_lanes(l["w2"].T, W_COLS),                               # rows [3H, 3H+FF)
        ], axis=0))                                                     # (160, 96)
        bqkv = jnp.concatenate([l["bq"], l["bk"], l["bv"]], axis=1)     # (1, 3H)
        vl.append(jnp.concatenate([
            bqkv,
            pad_lanes(l["bo"], W_COLS),
            pad_lanes(l["ln1_g"], W_COLS),
            pad_lanes(l["ln1_b"], W_COLS),
            pad_lanes(l["bi"], W_COLS),
            pad_lanes(l["b2"], W_COLS),
            pad_lanes(l["ln2_g"], W_COLS),
            pad_lanes(l["ln2_b"], W_COLS),
        ], axis=0))                                                     # (8, 96)

    return {
        # embedding tables stay f32 (used by the plain-JAX gather)
        "word_emb": p["word_emb"], "pos_emb": p["pos_emb"], "type_emb": p["type_emb"],
        "W_layers": jnp.stack(wl).astype(jnp.bfloat16),                 # (L, 160, 96) bf16
        "V_layers": jnp.stack(vl),                                      # (L, 8, 96)  f32
        "W_head": jnp.concatenate(
            [p["pooler_w"].T,
             jnp.pad(p["cls_w"].T, ((0, 0), (0, LANES - NUM_CLASSES)))],
            axis=1).astype(jnp.bfloat16),                               # (H, H+128) bf16
        "V_glob": jnp.concatenate(
            [pad_lanes(p["emb_ln_g"], LANES),
             pad_lanes(p["emb_ln_b"], LANES),
             pad_lanes(p["pooler_b"], LANES),
             jnp.pad(p["cls_b"], ((0, 0), (0, LANES - NUM_CLASSES)))],
            axis=0),                                                    # (4, 128) f32
    }


def _vmem():
    return pl.BlockSpec(memory_space=pltpu.MemorySpace.VMEM)


# ---------------- full forward (single fused kernel launch, 6 input DMAs) ----------------
@jax.jit
def bert_classifier_forward(model, input_ids, attention_mask):
    # Embedding gathers stay in plain JAX (gather glue); all token_type_ids == 0.
    pos_ids = jnp.arange(S, dtype=jnp.int32)
    emb = (jnp.take(model["word_emb"], input_ids, axis=0)
           + model["pos_emb"][pos_ids][None, :, :]
           + model["type_emb"][0][None, None, :])
    emb2d = emb.reshape(T, H)

    # Precomputed additive attention mask: block-diagonal over batches
    # (so attention can be batched over B inside one (T,T) score matrix)
    # combined with key-padding mask.
    key_mask = attention_mask.astype(jnp.float32).reshape(T)
    batch_id = jnp.repeat(jnp.arange(B, dtype=jnp.int32), S)
    same_batch = (batch_id[:, None] == batch_id[None, :]).astype(jnp.float32)
    attend = same_batch * key_mask[None, :]
    bias_mat = (1.0 - attend) * (-1e9)                                  # (T, T)

    out = pl.pallas_call(
        bert_fused_kernel,
        out_shape=jax.ShapeDtypeStruct((T, LANES), jnp.float32),
        in_specs=[_vmem()] * 6,
        out_specs=_vmem(),
    )(emb2d, bias_mat, model["W_layers"], model["V_layers"],
      model["W_head"], model["V_glob"])                                 # (T, 128)

    # CLS rows are 0, S, 2S, ... ; slice padded logits back to NUM_CLASSES.
    return out[::S, :NUM_CLASSES]                                       # (B, NUM_CLASSES)


if __name__ == "__main__":
    key = jax.random.PRNGKey(0)
    pkey, ikey = jax.random.split(key)
    params = init_params(pkey)

    # Hoisted out of the per-call path: packing/casting runs once at load time.
    model = jax.tree_util.tree_map(jax.block_until_ready,
                                   prepare_kernel_params(params))

    input_ids = jax.random.randint(ikey, (B, S), 0, VOCAB, dtype=jnp.int32)
    # batch 0 fully attended, batch 1 has 2 padding positions
    attention_mask = (jnp.arange(S)[None, :]
                      < jnp.array([[S], [S - 2]])).astype(jnp.int32)

    logits = bert_classifier_forward(model, input_ids, attention_mask)
    logits = jax.block_until_ready(logits)
    assert logits.shape == (B, NUM_CLASSES) and logits.dtype == jnp.float32
    assert bool(jnp.all(jnp.isfinite(logits)))
    print("KERNEL_OK")
</pallas_src>

<mosaic_0001>
module attributes {stable_mosaic.version = 11 : i64} {
  func.func @bert_fused_kernel(%arg0: memref<16x32xf32, #tpu.memory_space<vmem>>, %arg1: memref<16x16xf32, #tpu.memory_space<vmem>>, %arg2: memref<2x160x96xbf16, #tpu.memory_space<vmem>>, %arg3: memref<2x8x96xf32, #tpu.memory_space<vmem>>, %arg4: memref<32x160xbf16, #tpu.memory_space<vmem>>, %arg5: memref<4x128xf32, #tpu.memory_space<vmem>>, %arg6: memref<16x128xf32, #tpu.memory_space<vmem>>) attributes {dimension_semantics = [], scalar_prefetch = 0 : i64, scratch_operands = 0 : i64, tpu.core_type = #tpu.core_type<tc>} {
    %c0 = arith.constant 0 : index
    %c0_0 = arith.constant 0 : index
    %0 = vector.load %arg0[%c0, %c0_0] : memref<16x32xf32, #tpu.memory_space<vmem>>, vector<16x32xf32>
    %c0_1 = arith.constant 0 : index
    %c0_2 = arith.constant 0 : index
    %1 = vector.load %arg5[%c0_1, %c0_2] : memref<4x128xf32, #tpu.memory_space<vmem>>, vector<1x32xf32>
    %c1 = arith.constant 1 : index
    %c0_3 = arith.constant 0 : index
    %2 = vector.load %arg5[%c1, %c0_3] : memref<4x128xf32, #tpu.memory_space<vmem>>, vector<1x32xf32>
    %cst = arith.constant dense<0.000000e+00> : vector<16xf32>
    %3 = vector.multi_reduction <add>, %0, %cst [1] : vector<16x32xf32> to vector<16xf32>
    %4 = vector.shape_cast %3 : vector<16xf32> to vector<16x1xf32>
    %cst_4 = arith.constant 3.200000e+01 : f32
    %5 = vector.broadcast %cst_4 : f32 to vector<16x1xf32>
    %6 = arith.divf %4, %5 : vector<16x1xf32>
    %7 = vector.broadcast %6 : vector<16x1xf32> to vector<16x32xf32>
    %8 = arith.subf %0, %7 : vector<16x32xf32>
    %9 = arith.mulf %8, %8 : vector<16x32xf32>
    %cst_5 = arith.constant dense<0.000000e+00> : vector<16xf32>
    %10 = vector.multi_reduction <add>, %9, %cst_5 [1] : vector<16x32xf32> to vector<16xf32>
    %11 = vector.shape_cast %10 : vector<16xf32> to vector<16x1xf32>
    %cst_6 = arith.constant 3.200000e+01 : f32
    %12 = vector.broadcast %cst_6 : f32 to vector<16x1xf32>
    %13 = arith.divf %11, %12 : vector<16x1xf32>
    %14 = vector.broadcast %6 : vector<16x1xf32> to vector<16x32xf32>
    %15 = arith.subf %0, %14 : vector<16x32xf32>
    %cst_7 = arith.constant 9.99999996E-13 : f32
    %16 = vector.broadcast %cst_7 : f32 to vector<16x1xf32>
    %17 = arith.addf %13, %16 : vector<16x1xf32>
    %18 = math.rsqrt %17 : vector<16x1xf32>
    %19 = vector.broadcast %18 : vector<16x1xf32> to vector<16x32xf32>
    %20 = arith.mulf %15, %19 : vector<16x32xf32>
    %21 = vector.broadcast %1 : vector<1x32xf32> to vector<16x32xf32>
    %22 = arith.mulf %20, %21 : vector<16x32xf32>
    %23 = vector.broadcast %2 : vector<1x32xf32> to vector<16x32xf32>
    %24 = arith.addf %22, %23 : vector<16x32xf32>
    %c0_8 = arith.constant 0 : index
    %c0_9 = arith.constant 0 : index
    %25 = vector.load %arg1[%c0_8, %c0_9] : memref<16x16xf32, #tpu.memory_space<vmem>>, vector<16x16xf32>
    %c0_10 = arith.constant 0 : index
    %c0_11 = arith.constant 0 : index
    %c0_12 = arith.constant 0 : index
    %26 = vector.load %arg2[%c0_10, %c0_11, %c0_12] : memref<2x160x96xbf16, #tpu.memory_space<vmem>>, vector<1x32x96xbf16>
    %27 = vector.shape_cast %26 : vector<1x32x96xbf16> to vector<32x96xbf16>
    %c0_13 = arith.constant 0 : index
    %c32 = arith.constant 32 : index
    %c0_14 = arith.constant 0 : index
    %28 = vector.load %arg2[%c0_13, %c32, %c0_14] : memref<2x160x96xbf16, #tpu.memory_space<vmem>>, vector<1x32x32xbf16>
    %29 = vector.shape_cast %28 : vector<1x32x32xbf16> to vector<32x32xbf16>
    %c0_15 = arith.constant 0 : index
    %c64 = arith.constant 64 : index
    %c0_16 = arith.constant 0 : index
    %30 = vector.load %arg2[%c0_15, %c64, %c0_16] : memref<2x160x96xbf16, #tpu.memory_space<vmem>>, vector<1x32x64xbf16>
    %31 = vector.shape_cast %30 : vector<1x32x64xbf16> to vector<32x64xbf16>
    %c0_17 = arith.constant 0 : index
    %c96 = arith.constant 96 : index
    %c0_18 = arith.constant 0 : index
    %32 = vector.load %arg2[%c0_17, %c96, %c0_18] : memref<2x160x96xbf16, #tpu.memory_space<vmem>>, vector<1x64x32xbf16>
    %33 = vector.shape_cast %32 : vector<1x64x32xbf16> to vector<64x32xbf16>
    %c0_19 = arith.constant 0 : index
    %c0_20 = arith.constant 0 : index
    %c0_21 = arith.constant 0 : index
    %34 = vector.load %arg3[%c0_19, %c0_20, %c0_21] : memref<2x8x96xf32, #tpu.memory_space<vmem>>, vector<1x1x96xf32>
    %35 = vector.shape_cast %34 : vector<1x1x96xf32> to vector<1x96xf32>
    %c0_22 = arith.constant 0 : index
    %c1_23 = arith.constant 1 : index
    %c0_24 = arith.constant 0 : index
    %36 = vector.load %arg3[%c0_22, %c1_23, %c0_24] : memref<2x8x96xf32, #tpu.memory_space<vmem>>, vector<1x1x32xf32>
    %37 = vector.shape_cast %36 : vector<1x1x32xf32> to vector<1x32xf32>
    %c0_25 = arith.constant 0 : index
    %c2 = arith.constant 2 : index
    %c0_26 = arith.constant 0 : index
    %38 = vector.load %arg3[%c0_25, %c2, %c0_26] : memref<2x8x96xf32, #tpu.memory_space<vmem>>, vector<1x1x32xf32>
    %39 = vector.shape_cast %38 : vector<1x1x32xf32> to vector<1x32xf32>
    %c0_27 = arith.constant 0 : index
    %c3 = arith.constant 3 : index
    %c0_28 = arith.constant 0 : index
    %40 = vector.load %arg3[%c0_27, %c3, %c0_28] : memref<2x8x96xf32, #tpu.memory_space<vmem>>, vector<1x1x32xf32>
    %41 = vector.shape_cast %40 : vector<1x1x32xf32> to vector<1x32xf32>
    %c0_29 = arith.constant 0 : index
    %c4 = arith.constant 4 : index
    %c0_30 = arith.constant 0 : index
    %42 = vector.load %arg3[%c0_29, %c4, %c0_30] : memref<2x8x96xf32, #tpu.memory_space<vmem>>, vector<1x1x64xf32>
    %43 = vector.shape_cast %42 : vector<1x1x64xf32> to vector<1x64xf32>
    %c0_31 = arith.constant 0 : index
    %c5 = arith.constant 5 : index
    %c0_32 = arith.constant 0 : index
    %44 = vector.load %arg3[%c0_31, %c5, %c0_32] : memref<2x8x96xf32, #tpu.memory_space<vmem>>, vector<1x1x32xf32>
    %45 = vector.shape_cast %44 : vector<1x1x32xf32> to vector<1x32xf32>
    %c0_33 = arith.constant 0 : index
    %c6 = arith.constant 6 : index
    %c0_34 = arith.constant 0 : index
    %46 = vector.load %arg3[%c0_33, %c6, %c0_34] : memref<2x8x96xf32, #tpu.memory_space<vmem>>, vector<1x1x32xf32>
    %47 = vector.shape_cast %46 : vector<1x1x32xf32> to vector<1x32xf32>
    %c0_35 = arith.constant 0 : index
    %c7 = arith.constant 7 : index
    %c0_36 = arith.constant 0 : index
    %48 = vector.load %arg3[%c0_35, %c7, %c0_36] : memref<2x8x96xf32, #tpu.memory_space<vmem>>, vector<1x1x32xf32>
    %49 = vector.shape_cast %48 : vector<1x1x32xf32> to vector<1x32xf32>
    %50 = arith.truncf %24 : vector<16x32xf32> to vector<16x32xbf16>
    %cst_37 = arith.constant dense<0.000000e+00> : vector<16x96xf32>
    %51 = tpu.matmul %50, %27, %cst_37 {dimension_numbers = #tpu.dot_dimension_numbers<[1], [0], [0], [1], [0, 0, 1, 1], [], []>} : vector<16x32xbf16>, vector<32x96xbf16>, vector<16x96xf32> -> vector<16x96xf32>
    %52 = vector.broadcast %35 : vector<1x96xf32> to vector<16x96xf32>
    %53 = arith.addf %51, %52 : vector<16x96xf32>
    %54 = arith.truncf %53 : vector<16x96xf32> to vector<16x96xbf16>
    %55 = vector.extract_strided_slice %54 {offsets = [0, 0], sizes = [16, 8], strides = [1, 1]} : vector<16x96xbf16> to vector<16x8xbf16>
    %56 = vector.extract_strided_slice %54 {offsets = [0, 32], sizes = [16, 8], strides = [1, 1]} : vector<16x96xbf16> to vector<16x8xbf16>
    %57 = vector.extract_strided_slice %54 {offsets = [0, 64], sizes = [16, 8], strides = [1, 1]} : vector<16x96xbf16> to vector<16x8xbf16>
    %cst_38 = arith.constant dense<0.000000e+00> : vector<16x16xf32>
    %58 = tpu.matmul %55, %56, %cst_38 {dimension_numbers = #tpu.dot_dimension_numbers<[1], [1], [0], [0], [0, 0, 1, 0], [], []>} : vector<16x8xbf16>, vector<16x8xbf16>, vector<16x16xf32> -> vector<16x16xf32>
    %cst_39 = arith.constant 0.353553385 : f32
    %59 = vector.broadcast %cst_39 : f32 to vector<16x16xf32>
    %60 = arith.mulf %58, %59 : vector<16x16xf32>
    %61 = arith.addf %60, %25 : vector<16x16xf32>
    %cst_40 = arith.constant dense<0xFF800000> : vector<16xf32>
    %62 = vector.multi_reduction <maximumf>, %61, %cst_40 [1] : vector<16x16xf32> to vector<16xf32>
    %63 = vector.shape_cast %62 : vector<16xf32> to vector<16x1xf32>
    %64 = vector.broadcast %63 : vector<16x1xf32> to vector<16x16xf32>
    %65 = arith.subf %61, %64 : vector<16x16xf32>
    %66 = math.exp %65 : vector<16x16xf32>
    %cst_41 = arith.constant dense<0.000000e+00> : vector<16xf32>
    %67 = vector.multi_reduction <add>, %66, %cst_41 [1] : vector<16x16xf32> to vector<16xf32>
    %68 = vector.shape_cast %67 : vector<16xf32> to vector<16x1xf32>
    %69 = tpu.reciprocal %68 {approx = true} : vector<16x1xf32> -> vector<16x1xf32>
    %70 = vector.broadcast %69 : vector<16x1xf32> to vector<16x16xf32>
    %71 = arith.mulf %66, %70 : vector<16x16xf32>
    %72 = arith.truncf %71 : vector<16x16xf32> to vector<16x16xbf16>
    %cst_42 = arith.constant dense<0.000000e+00> : vector<16x8xf32>
    %73 = tpu.matmul %72, %57, %cst_42 {dimension_numbers = #tpu.dot_dimension_numbers<[1], [0], [0], [1], [0, 0, 1, 1], [], []>} : vector<16x16xbf16>, vector<16x8xbf16>, vector<16x8xf32> -> vector<16x8xf32>
    %74 = vector.extract_strided_slice %54 {offsets = [0, 8], sizes = [16, 8], strides = [1, 1]} : vector<16x96xbf16> to vector<16x8xbf16>
    %75 = vector.extract_strided_slice %54 {offsets = [0, 40], sizes = [16, 8], strides = [1, 1]} : vector<16x96xbf16> to vector<16x8xbf16>
    %76 = vector.extract_strided_slice %54 {offsets = [0, 72], sizes = [16, 8], strides = [1, 1]} : vector<16x96xbf16> to vector<16x8xbf16>
    %cst_43 = arith.constant dense<0.000000e+00> : vector<16x16xf32>
    %77 = tpu.matmul %74, %75, %cst_43 {dimension_numbers = #tpu.dot_dimension_numbers<[1], [1], [0], [0], [0, 0, 1, 0], [], []>} : vector<16x8xbf16>, vector<16x8xbf16>, vector<16x16xf32> -> vector<16x16xf32>
    %cst_44 = arith.constant 0.353553385 : f32
    %78 = vector.broadcast %cst_44 : f32 to vector<16x16xf32>
    %79 = arith.mulf %77, %78 : vector<16x16xf32>
    %80 = arith.addf %79, %25 : vector<16x16xf32>
    %cst_45 = arith.constant dense<0xFF800000> : vector<16xf32>
    %81 = vector.multi_reduction <maximumf>, %80, %cst_45 [1] : vector<16x16xf32> to vector<16xf32>
    %82 = vector.shape_cast %81 : vector<16xf32> to vector<16x1xf32>
    %83 = vector.broadcast %82 : vector<16x1xf32> to vector<16x16xf32>
    %84 = arith.subf %80, %83 : vector<16x16xf32>
    %85 = math.exp %84 : vector<16x16xf32>
    %cst_46 = arith.constant dense<0.000000e+00> : vector<16xf32>
    %86 = vector.multi_reduction <add>, %85, %cst_46 [1] : vector<16x16xf32> to vector<16xf32>
    %87 = vector.shape_cast %86 : vector<16xf32> to vector<16x1xf32>
    %88 = tpu.reciprocal %87 {approx = true} : vector<16x1xf32> -> vector<16x1xf32>
    %89 = vector.broadcast %88 : vector<16x1xf32> to vector<16x16xf32>
    %90 = arith.mulf %85, %89 : vector<16x16xf32>
    %91 = arith.truncf %90 : vector<16x16xf32> to vector<16x16xbf16>
    %cst_47 = arith.constant dense<0.000000e+00> : vector<16x8xf32>
    %92 = tpu.matmul %91, %76, %cst_47 {dimension_numbers = #tpu.dot_dimension_numbers<[1], [0], [0], [1], [0, 0, 1, 1], [], []>} : vector<16x16xbf16>, vector<16x8xbf16>, vector<16x8xf32> -> vector<16x8xf32>
    %93 = vector.extract_strided_slice %54 {offsets = [0, 16], sizes = [16, 8], strides = [1, 1]} : vector<16x96xbf16> to vector<16x8xbf16>
    %94 = vector.extract_strided_slice %54 {offsets = [0, 48], sizes = [16, 8], strides = [1, 1]} : vector<16x96xbf16> to vector<16x8xbf16>
    %95 = vector.extract_strided_slice %54 {offsets = [0, 80], sizes = [16, 8], strides = [1, 1]} : vector<16x96xbf16> to vector<16x8xbf16>
    %cst_48 = arith.constant dense<0.000000e+00> : vector<16x16xf32>
    %96 = tpu.matmul %93, %94, %cst_48 {dimension_numbers = #tpu.dot_dimension_numbers<[1], [1], [0], [0], [0, 0, 1, 0], [], []>} : vector<16x8xbf16>, vector<16x8xbf16>, vector<16x16xf32> -> vector<16x16xf32>
    %cst_49 = arith.constant 0.353553385 : f32
    %97 = vector.broadcast %cst_49 : f32 to vector<16x16xf32>
    %98 = arith.mulf %96, %97 : vector<16x16xf32>
    %99 = arith.addf %98, %25 : vector<16x16xf32>
    %cst_50 = arith.constant dense<0xFF800000> : vector<16xf32>
    %100 = vector.multi_reduction <maximumf>, %99, %cst_50 [1] : vector<16x16xf32> to vector<16xf32>
    %101 = vector.shape_cast %100 : vector<16xf32> to vector<16x1xf32>
    %102 = vector.broadcast %101 : vector<16x1xf32> to vector<16x16xf32>
    %103 = arith.subf %99, %102 : vector<16x16xf32>
    %104 = math.exp %103 : vector<16x16xf32>
    %cst_51 = arith.constant dense<0.000000e+00> : vector<16xf32>
    %105 = vector.multi_reduction <add>, %104, %cst_51 [1] : vector<16x16xf32> to vector<16xf32>
    %106 = vector.shape_cast %105 : vector<16xf32> to vector<16x1xf32>
    %107 = tpu.reciprocal %106 {approx = true} : vector<16x1xf32> -> vector<16x1xf32>
    %108 = vector.broadcast %107 : vector<16x1xf32> to vector<16x16xf32>
    %109 = arith.mulf %104, %108 : vector<16x16xf32>
    %110 = arith.truncf %109 : vector<16x16xf32> to vector<16x16xbf16>
    %cst_52 = arith.constant dense<0.000000e+00> : vector<16x8xf32>
    %111 = tpu.matmul %110, %95, %cst_52 {dimension_numbers = #tpu.dot_dimension_numbers<[1], [0], [0], [1], [0, 0, 1, 1], [], []>} : vector<16x16xbf16>, vector<16x8xbf16>, vector<16x8xf32> -> vector<16x8xf32>
    %112 = vector.extract_strided_slice %54 {offsets = [0, 24], sizes = [16, 8], strides = [1, 1]} : vector<16x96xbf16> to vector<16x8xbf16>
    %113 = vector.extract_strided_slice %54 {offsets = [0, 56], sizes = [16, 8], strides = [1, 1]} : vector<16x96xbf16> to vector<16x8xbf16>
    %114 = vector.extract_strided_slice %54 {offsets = [0, 88], sizes = [16, 8], strides = [1, 1]} : vector<16x96xbf16> to vector<16x8xbf16>
    %cst_53 = arith.constant dense<0.000000e+00> : vector<16x16xf32>
    %115 = tpu.matmul %112, %113, %cst_53 {dimension_numbers = #tpu.dot_dimension_numbers<[1], [1], [0], [0], [0, 0, 1, 0], [], []>} : vector<16x8xbf16>, vector<16x8xbf16>, vector<16x16xf32> -> vector<16x16xf32>
    %cst_54 = arith.constant 0.353553385 : f32
    %116 = vector.broadcast %cst_54 : f32 to vector<16x16xf32>
    %117 = arith.mulf %115, %116 : vector<16x16xf32>
    %118 = arith.addf %117, %25 : vector<16x16xf32>
    %cst_55 = arith.constant dense<0xFF800000> : vector<16xf32>
    %119 = vector.multi_reduction <maximumf>, %118, %cst_55 [1] : vector<16x16xf32> to vector<16xf32>
    %120 = vector.shape_cast %119 : vector<16xf32> to vector<16x1xf32>
    %121 = vector.broadcast %120 : vector<16x1xf32> to vector<16x16xf32>
    %122 = arith.subf %118, %121 : vector<16x16xf32>
    %123 = math.exp %122 : vector<16x16xf32>
    %cst_56 = arith.constant dense<0.000000e+00> : vector<16xf32>
    %124 = vector.multi_reduction <add>, %123, %cst_56 [1] : vector<16x16xf32> to vector<16xf32>
    %125 = vector.shape_cast %124 : vector<16xf32> to vector<16x1xf32>
    %126 = tpu.reciprocal %125 {approx = true} : vector<16x1xf32> -> vector<16x1xf32>
    %127 = vector.broadcast %126 : vector<16x1xf32> to vector<16x16xf32>
    %128 = arith.mulf %123, %127 : vector<16x16xf32>
    %129 = arith.truncf %128 : vector<16x16xf32> to vector<16x16xbf16>
    %cst_57 = arith.constant dense<0.000000e+00> : vector<16x8xf32>
    %130 = tpu.matmul %129, %114, %cst_57 {dimension_numbers = #tpu.dot_dimension_numbers<[1], [0], [0], [1], [0, 0, 1, 1], [], []>} : vector<16x16xbf16>, vector<16x8xbf16>, vector<16x8xf32> -> vector<16x8xf32>
    %131 = tpu.concatenate %73, %92, %111, %130 in 1 : vector<16x8xf32>, vector<16x8xf32>, vector<16x8xf32>, vector<16x8xf32> -> vector<16x32xf32>
    %132 = arith.truncf %131 : vector<16x32xf32> to vector<16x32xbf16>
    %cst_58 = arith.constant dense<0.000000e+00> : vector<16x32xf32>
    %133 = tpu.matmul %132, %29, %cst_58 {dimension_numbers = #tpu.dot_dimension_numbers<[1], [0], [0], [1], [0, 0, 1, 1], [], []>} : vector<16x32xbf16>, vector<32x32xbf16>, vector<16x32xf32> -> vector<16x32xf32>
    %134 = vector.broadcast %37 : vector<1x32xf32> to vector<16x32xf32>
    %135 = arith.addf %133, %134 : vector<16x32xf32>
    %136 = arith.addf %135, %24 : vector<16x32xf32>
    %cst_59 = arith.constant dense<0.000000e+00> : vector<16xf32>
    %137 = vector.multi_reduction <add>, %136, %cst_59 [1] : vector<16x32xf32> to vector<16xf32>
    %138 = vector.shape_cast %137 : vector<16xf32> to vector<16x1xf32>
    %cst_60 = arith.constant 3.200000e+01 : f32
    %139 = vector.broadcast %cst_60 : f32 to vector<16x1xf32>
    %140 = arith.divf %138, %139 : vector<16x1xf32>
    %141 = vector.broadcast %140 : vector<16x1xf32> to vector<16x32xf32>
    %142 = arith.subf %136, %141 : vector<16x32xf32>
    %143 = arith.mulf %142, %142 : vector<16x32xf32>
    %cst_61 = arith.constant dense<0.000000e+00> : vector<16xf32>
    %144 = vector.multi_reduction <add>, %143, %cst_61 [1] : vector<16x32xf32> to vector<16xf32>
    %145 = vector.shape_cast %144 : vector<16xf32> to vector<16x1xf32>
    %cst_62 = arith.constant 3.200000e+01 : f32
    %146 = vector.broadcast %cst_62 : f32 to vector<16x1xf32>
    %147 = arith.divf %145, %146 : vector<16x1xf32>
    %148 = vector.broadcast %140 : vector<16x1xf32> to vector<16x32xf32>
    %149 = arith.subf %136, %148 : vector<16x32xf32>
    %cst_63 = arith.constant 9.99999996E-13 : f32
    %150 = vector.broadcast %cst_63 : f32 to vector<16x1xf32>
    %151 = arith.addf %147, %150 : vector<16x1xf32>
    %152 = math.rsqrt %151 : vector<16x1xf32>
    %153 = vector.broadcast %152 : vector<16x1xf32> to vector<16x32xf32>
    %154 = arith.mulf %149, %153 : vector<16x32xf32>
    %155 = vector.broadcast %39 : vector<1x32xf32> to vector<16x32xf32>
    %156 = arith.mulf %154, %155 : vector<16x32xf32>
    %157 = vector.broadcast %41 : vector<1x32xf32> to vector<16x32xf32>
    %158 = arith.addf %156, %157 : vector<16x32xf32>
    %159 = arith.truncf %158 : vector<16x32xf32> to vector<16x32xbf16>
    %cst_64 = arith.constant dense<0.000000e+00> : vector<16x64xf32>
    %160 = tpu.matmul %159, %31, %cst_64 {dimension_numbers = #tpu.dot_dimension_numbers<[1], [0], [0], [1], [0, 0, 1, 1], [], []>} : vector<16x32xbf16>, vector<32x64xbf16>, vector<16x64xf32> -> vector<16x64xf32>
    %161 = vector.broadcast %43 : vector<1x64xf32> to vector<16x64xf32>
    %162 = arith.addf %160, %161 : vector<16x64xf32>
    %cst_65 = arith.constant 5.000000e-01 : f32
    %163 = vector.broadcast %cst_65 : f32 to vector<16x64xf32>
    %164 = arith.mulf %163, %162 : vector<16x64xf32>
    %cst_66 = arith.constant 4.471500e-02 : f32
    %165 = vector.broadcast %cst_66 : f32 to vector<16x64xf32>
    %166 = arith.mulf %165, %162 : vector<16x64xf32>
    %167 = arith.mulf %166, %162 : vector<16x64xf32>
    %168 = arith.mulf %167, %162 : vector<16x64xf32>
    %169 = arith.addf %162, %168 : vector<16x64xf32>
    %cst_67 = arith.constant 0.797884583 : f32
    %170 = vector.broadcast %cst_67 : f32 to vector<16x64xf32>
    %171 = arith.mulf %170, %169 : vector<16x64xf32>
    %172 = math.tanh %171 : vector<16x64xf32>
    %cst_68 = arith.constant 1.000000e+00 : f32
    %173 = vector.broadcast %cst_68 : f32 to vector<16x64xf32>
    %174 = arith.addf %173, %172 : vector<16x64xf32>
    %175 = arith.mulf %164, %174 : vector<16x64xf32>
    %176 = arith.truncf %175 : vector<16x64xf32> to vector<16x64xbf16>
    %cst_69 = arith.constant dense<0.000000e+00> : vector<16x32xf32>
    %177 = tpu.matmul %176, %33, %cst_69 {dimension_numbers = #tpu.dot_dimension_numbers<[1], [0], [0], [1], [0, 0, 1, 1], [], []>} : vector<16x64xbf16>, vector<64x32xbf16>, vector<16x32xf32> -> vector<16x32xf32>
    %178 = vector.broadcast %45 : vector<1x32xf32> to vector<16x32xf32>
    %179 = arith.addf %177, %178 : vector<16x32xf32>
    %180 = arith.addf %179, %158 : vector<16x32xf32>
    %cst_70 = arith.constant dense<0.000000e+00> : vector<16xf32>
    %181 = vector.multi_reduction <add>, %180, %cst_70 [1] : vector<16x32xf32> to vector<16xf32>
    %182 = vector.shape_cast %181 : vector<16xf32> to vector<16x1xf32>
    %cst_71 = arith.constant 3.200000e+01 : f32
    %183 = vector.broadcast %cst_71 : f32 to vector<16x1xf32>
    %184 = arith.divf %182, %183 : vector<16x1xf32>
    %185 = vector.broadcast %184 : vector<16x1xf32> to vector<16x32xf32>
    %186 = arith.subf %180, %185 : vector<16x32xf32>
    %187 = arith.mulf %186, %186 : vector<16x32xf32>
    %cst_72 = arith.constant dense<0.000000e+00> : vector<16xf32>
    %188 = vector.multi_reduction <add>, %187, %cst_72 [1] : vector<16x32xf32> to vector<16xf32>
    %189 = vector.shape_cast %188 : vector<16xf32> to vector<16x1xf32>
    %cst_73 = arith.constant 3.200000e+01 : f32
    %190 = vector.broadcast %cst_73 : f32 to vector<16x1xf32>
    %191 = arith.divf %189, %190 : vector<16x1xf32>
    %192 = vector.broadcast %184 : vector<16x1xf32> to vector<16x32xf32>
    %193 = arith.subf %180, %192 : vector<16x32xf32>
    %cst_74 = arith.constant 9.99999996E-13 : f32
    %194 = vector.broadcast %cst_74 : f32 to vector<16x1xf32>
    %195 = arith.addf %191, %194 : vector<16x1xf32>
    %196 = math.rsqrt %195 : vector<16x1xf32>
    %197 = vector.broadcast %196 : vector<16x1xf32> to vector<16x32xf32>
    %198 = arith.mulf %193, %197 : vector<16x32xf32>
    %199 = vector.broadcast %47 : vector<1x32xf32> to vector<16x32xf32>
    %200 = arith.mulf %198, %199 : vector<16x32xf32>
    %201 = vector.broadcast %49 : vector<1x32xf32> to vector<16x32xf32>
    %202 = arith.addf %200, %201 : vector<16x32xf32>
    %c1_75 = arith.constant 1 : index
    %c0_76 = arith.constant 0 : index
    %c0_77 = arith.constant 0 : index
    %203 = vector.load %arg2[%c1_75, %c0_76, %c0_77] : memref<2x160x96xbf16, #tpu.memory_space<vmem>>, vector<1x32x96xbf16>
    %204 = vector.shape_cast %203 : vector<1x32x96xbf16> to vector<32x96xbf16>
    %c1_78 = arith.constant 1 : index
    %c32_79 = arith.constant 32 : index
    %c0_80 = arith.constant 0 : index
    %205 = vector.load %arg2[%c1_78, %c32_79, %c0_80] : memref<2x160x96xbf16, #tpu.memory_space<vmem>>, vector<1x32x32xbf16>
    %206 = vector.shape_cast %205 : vector<1x32x32xbf16> to vector<32x32xbf16>
    %c1_81 = arith.constant 1 : index
    %c64_82 = arith.constant 64 : index
    %c0_83 = arith.constant 0 : index
    %207 = vector.load %arg2[%c1_81, %c64_82, %c0_83] : memref<2x160x96xbf16, #tpu.memory_space<vmem>>, vector<1x32x64xbf16>
    %208 = vector.shape_cast %207 : vector<1x32x64xbf16> to vector<32x64xbf16>
    %c1_84 = arith.constant 1 : index
    %c96_85 = arith.constant 96 : index
    %c0_86 = arith.constant 0 : index
    %209 = vector.load %arg2[%c1_84, %c96_85, %c0_86] : memref<2x160x96xbf16, #tpu.memory_space<vmem>>, vector<1x64x32xbf16>
    %210 = vector.shape_cast %209 : vector<1x64x32xbf16> to vector<64x32xbf16>
    %c1_87 = arith.constant 1 : index
    %c0_88 = arith.constant 0 : index
    %c0_89 = arith.constant 0 : index
    %211 = vector.load %arg3[%c1_87, %c0_88, %c0_89] : memref<2x8x96xf32, #tpu.memory_space<vmem>>, vector<1x1x96xf32>
    %212 = vector.shape_cast %211 : vector<1x1x96xf32> to vector<1x96xf32>
    %c1_90 = arith.constant 1 : index
    %c1_91 = arith.constant 1 : index
    %c0_92 = arith.constant 0 : index
    %213 = vector.load %arg3[%c1_90, %c1_91, %c0_92] : memref<2x8x96xf32, #tpu.memory_space<vmem>>, vector<1x1x32xf32>
    %214 = vector.shape_cast %213 : vector<1x1x32xf32> to vector<1x32xf32>
    %c1_93 = arith.constant 1 : index
    %c2_94 = arith.constant 2 : index
    %c0_95 = arith.constant 0 : index
    %215 = vector.load %arg3[%c1_93, %c2_94, %c0_95] : memref<2x8x96xf32, #tpu.memory_space<vmem>>, vector<1x1x32xf32>
    %216 = vector.shape_cast %215 : vector<1x1x32xf32> to vector<1x32xf32>
    %c1_96 = arith.constant 1 : index
    %c3_97 = arith.constant 3 : index
    %c0_98 = arith.constant 0 : index
    %217 = vector.load %arg3[%c1_96, %c3_97, %c0_98] : memref<2x8x96xf32, #tpu.memory_space<vmem>>, vector<1x1x32xf32>
    %218 = vector.shape_cast %217 : vector<1x1x32xf32> to vector<1x32xf32>
    %c1_99 = arith.constant 1 : index
    %c4_100 = arith.constant 4 : index
    %c0_101 = arith.constant 0 : index
    %219 = vector.load %arg3[%c1_99, %c4_100, %c0_101] : memref<2x8x96xf32, #tpu.memory_space<vmem>>, vector<1x1x64xf32>
    %220 = vector.shape_cast %219 : vector<1x1x64xf32> to vector<1x64xf32>
    %c1_102 = arith.constant 1 : index
    %c5_103 = arith.constant 5 : index
    %c0_104 = arith.constant 0 : index
    %221 = vector.load %arg3[%c1_102, %c5_103, %c0_104] : memref<2x8x96xf32, #tpu.memory_space<vmem>>, vector<1x1x32xf32>
    %222 = vector.shape_cast %221 : vector<1x1x32xf32> to vector<1x32xf32>
    %c1_105 = arith.constant 1 : index
    %c6_106 = arith.constant 6 : index
    %c0_107 = arith.constant 0 : index
    %223 = vector.load %arg3[%c1_105, %c6_106, %c0_107] : memref<2x8x96xf32, #tpu.memory_space<vmem>>, vector<1x1x32xf32>
    %224 = vector.shape_cast %223 : vector<1x1x32xf32> to vector<1x32xf32>
    %c1_108 = arith.constant 1 : index
    %c7_109 = arith.constant 7 : index
    %c0_110 = arith.constant 0 : index
    %225 = vector.load %arg3[%c1_108, %c7_109, %c0_110] : memref<2x8x96xf32, #tpu.memory_space<vmem>>, vector<1x1x32xf32>
    %226 = vector.shape_cast %225 : vector<1x1x32xf32> to vector<1x32xf32>
    %227 = arith.truncf %202 : vector<16x32xf32> to vector<16x32xbf16>
    %cst_111 = arith.constant dense<0.000000e+00> : vector<16x96xf32>
    %228 = tpu.matmul %227, %204, %cst_111 {dimension_numbers = #tpu.dot_dimension_numbers<[1], [0], [0], [1], [0, 0, 1, 1], [], []>} : vector<16x32xbf16>, vector<32x96xbf16>, vector<16x96xf32> -> vector<16x96xf32>
    %229 = vector.broadcast %212 : vector<1x96xf32> to vector<16x96xf32>
    %230 = arith.addf %228, %229 : vector<16x96xf32>
    %231 = arith.truncf %230 : vector<16x96xf32> to vector<16x96xbf16>
    %232 = vector.extract_strided_slice %231 {offsets = [0, 0], sizes = [16, 8], strides = [1, 1]} : vector<16x96xbf16> to vector<16x8xbf16>
    %233 = vector.extract_strided_slice %231 {offsets = [0, 32], sizes = [16, 8], strides = [1, 1]} : vector<16x96xbf16> to vector<16x8xbf16>
    %234 = vector.extract_strided_slice %231 {offsets = [0, 64], sizes = [16, 8], strides = [1, 1]} : vector<16x96xbf16> to vector<16x8xbf16>
    %cst_112 = arith.constant dense<0.000000e+00> : vector<16x16xf32>
    %235 = tpu.matmul %232, %233, %cst_112 {dimension_numbers = #tpu.dot_dimension_numbers<[1], [1], [0], [0], [0, 0, 1, 0], [], []>} : vector<16x8xbf16>, vector<16x8xbf16>, vector<16x16xf32> -> vector<16x16xf32>
    %cst_113 = arith.constant 0.353553385 : f32
    %236 = vector.broadcast %cst_113 : f32 to vector<16x16xf32>
    %237 = arith.mulf %235, %236 : vector<16x16xf32>
    %238 = arith.addf %237, %25 : vector<16x16xf32>
    %cst_114 = arith.constant dense<0xFF800000> : vector<16xf32>
    %239 = vector.multi_reduction <maximumf>, %238, %cst_114 [1] : vector<16x16xf32> to vector<16xf32>
    %240 = vector.shape_cast %239 : vector<16xf32> to vector<16x1xf32>
    %241 = vector.broadcast %240 : vector<16x1xf32> to vector<16x16xf32>
    %242 = arith.subf %238, %241 : vector<16x16xf32>
    %243 = math.exp %242 : vector<16x16xf32>
    %cst_115 = arith.constant dense<0.000000e+00> : vector<16xf32>
    %244 = vector.multi_reduction <add>, %243, %cst_115 [1] : vector<16x16xf32> to vector<16xf32>
    %245 = vector.shape_cast %244 : vector<16xf32> to vector<16x1xf32>
    %246 = tpu.reciprocal %245 {approx = true} : vector<16x1xf32> -> vector<16x1xf32>
    %247 = vector.broadcast %246 : vector<16x1xf32> to vector<16x16xf32>
    %248 = arith.mulf %243, %247 : vector<16x16xf32>
    %249 = arith.truncf %248 : vector<16x16xf32> to vector<16x16xbf16>
    %cst_116 = arith.constant dense<0.000000e+00> : vector<16x8xf32>
    %250 = tpu.matmul %249, %234, %cst_116 {dimension_numbers = #tpu.dot_dimension_numbers<[1], [0], [0], [1], [0, 0, 1, 1], [], []>} : vector<16x16xbf16>, vector<16x8xbf16>, vector<16x8xf32> -> vector<16x8xf32>
    %251 = vector.extract_strided_slice %231 {offsets = [0, 8], sizes = [16, 8], strides = [1, 1]} : vector<16x96xbf16> to vector<16x8xbf16>
    %252 = vector.extract_strided_slice %231 {offsets = [0, 40], sizes = [16, 8], strides = [1, 1]} : vector<16x96xbf16> to vector<16x8xbf16>
    %253 = vector.extract_strided_slice %231 {offsets = [0, 72], sizes = [16, 8], strides = [1, 1]} : vector<16x96xbf16> to vector<16x8xbf16>
    %cst_117 = arith.constant dense<0.000000e+00> : vector<16x16xf32>
    %254 = tpu.matmul %251, %252, %cst_117 {dimension_numbers = #tpu.dot_dimension_numbers<[1], [1], [0], [0], [0, 0, 1, 0], [], []>} : vector<16x8xbf16>, vector<16x8xbf16>, vector<16x16xf32> -> vector<16x16xf32>
    %cst_118 = arith.constant 0.353553385 : f32
    %255 = vector.broadcast %cst_118 : f32 to vector<16x16xf32>
    %256 = arith.mulf %254, %255 : vector<16x16xf32>
    %257 = arith.addf %256, %25 : vector<16x16xf32>
    %cst_119 = arith.constant dense<0xFF800000> : vector<16xf32>
    %258 = vector.multi_reduction <maximumf>, %257, %cst_119 [1] : vector<16x16xf32> to vector<16xf32>
    %259 = vector.shape_cast %258 : vector<16xf32> to vector<16x1xf32>
    %260 = vector.broadcast %259 : vector<16x1xf32> to vector<16x16xf32>
    %261 = arith.subf %257, %260 : vector<16x16xf32>
    %262 = math.exp %261 : vector<16x16xf32>
    %cst_120 = arith.constant dense<0.000000e+00> : vector<16xf32>
    %263 = vector.multi_reduction <add>, %262, %cst_120 [1] : vector<16x16xf32> to vector<16xf32>
    %264 = vector.shape_cast %263 : vector<16xf32> to vector<16x1xf32>
    %265 = tpu.reciprocal %264 {approx = true} : vector<16x1xf32> -> vector<16x1xf32>
    %266 = vector.broadcast %265 : vector<16x1xf32> to vector<16x16xf32>
    %267 = arith.mulf %262, %266 : vector<16x16xf32>
    %268 = arith.truncf %267 : vector<16x16xf32> to vector<16x16xbf16>
    %cst_121 = arith.constant dense<0.000000e+00> : vector<16x8xf32>
    %269 = tpu.matmul %268, %253, %cst_121 {dimension_numbers = #tpu.dot_dimension_numbers<[1], [0], [0], [1], [0, 0, 1, 1], [], []>} : vector<16x16xbf16>, vector<16x8xbf16>, vector<16x8xf32> -> vector<16x8xf32>
    %270 = vector.extract_strided_slice %231 {offsets = [0, 16], sizes = [16, 8], strides = [1, 1]} : vector<16x96xbf16> to vector<16x8xbf16>
    %271 = vector.extract_strided_slice %231 {offsets = [0, 48], sizes = [16, 8], strides = [1, 1]} : vector<16x96xbf16> to vector<16x8xbf16>
    %272 = vector.extract_strided_slice %231 {offsets = [0, 80], sizes = [16, 8], strides = [1, 1]} : vector<16x96xbf16> to vector<16x8xbf16>
    %cst_122 = arith.constant dense<0.000000e+00> : vector<16x16xf32>
    %273 = tpu.matmul %270, %271, %cst_122 {dimension_numbers = #tpu.dot_dimension_numbers<[1], [1], [0], [0], [0, 0, 1, 0], [], []>} : vector<16x8xbf16>, vector<16x8xbf16>, vector<16x16xf32> -> vector<16x16xf32>
    %cst_123 = arith.constant 0.353553385 : f32
    %274 = vector.broadcast %cst_123 : f32 to vector<16x16xf32>
    %275 = arith.mulf %273, %274 : vector<16x16xf32>
    %276 = arith.addf %275, %25 : vector<16x16xf32>
    %cst_124 = arith.constant dense<0xFF800000> : vector<16xf32>
    %277 = vector.multi_reduction <maximumf>, %276, %cst_124 [1] : vector<16x16xf32> to vector<16xf32>
    %278 = vector.shape_cast %277 : vector<16xf32> to vector<16x1xf32>
    %279 = vector.broadcast %278 : vector<16x1xf32> to vector<16x16xf32>
    %280 = arith.subf %276, %279 : vector<16x16xf32>
    %281 = math.exp %280 : vector<16x16xf32>
    %cst_125 = arith.constant dense<0.000000e+00> : vector<16xf32>
    %282 = vector.multi_reduction <add>, %281, %cst_125 [1] : vector<16x16xf32> to vector<16xf32>
    %283 = vector.shape_cast %282 : vector<16xf32> to vector<16x1xf32>
    %284 = tpu.reciprocal %283 {approx = true} : vector<16x1xf32> -> vector<16x1xf32>
    %285 = vector.broadcast %284 : vector<16x1xf32> to vector<16x16xf32>
    %286 = arith.mulf %281, %285 : vector<16x16xf32>
    %287 = arith.truncf %286 : vector<16x16xf32> to vector<16x16xbf16>
    %cst_126 = arith.constant dense<0.000000e+00> : vector<16x8xf32>
    %288 = tpu.matmul %287, %272, %cst_126 {dimension_numbers = #tpu.dot_dimension_numbers<[1], [0], [0], [1], [0, 0, 1, 1], [], []>} : vector<16x16xbf16>, vector<16x8xbf16>, vector<16x8xf32> -> vector<16x8xf32>
    %289 = vector.extract_strided_slice %231 {offsets = [0, 24], sizes = [16, 8], strides = [1, 1]} : vector<16x96xbf16> to vector<16x8xbf16>
    %290 = vector.extract_strided_slice %231 {offsets = [0, 56], sizes = [16, 8], strides = [1, 1]} : vector<16x96xbf16> to vector<16x8xbf16>
    %291 = vector.extract_strided_slice %231 {offsets = [0, 88], sizes = [16, 8], strides = [1, 1]} : vector<16x96xbf16> to vector<16x8xbf16>
    %cst_127 = arith.constant dense<0.000000e+00> : vector<16x16xf32>
    %292 = tpu.matmul %289, %290, %cst_127 {dimension_numbers = #tpu.dot_dimension_numbers<[1], [1], [0], [0], [0, 0, 1, 0], [], []>} : vector<16x8xbf16>, vector<16x8xbf16>, vector<16x16xf32> -> vector<16x16xf32>
    %cst_128 = arith.constant 0.353553385 : f32
    %293 = vector.broadcast %cst_128 : f32 to vector<16x16xf32>
    %294 = arith.mulf %292, %293 : vector<16x16xf32>
    %295 = arith.addf %294, %25 : vector<16x16xf32>
    %cst_129 = arith.constant dense<0xFF800000> : vector<16xf32>
    %296 = vector.multi_reduction <maximumf>, %295, %cst_129 [1] : vector<16x16xf32> to vector<16xf32>
    %297 = vector.shape_cast %296 : vector<16xf32> to vector<16x1xf32>
    %298 = vector.broadcast %297 : vector<16x1xf32> to vector<16x16xf32>
    %299 = arith.subf %295, %298 : vector<16x16xf32>
    %300 = math.exp %299 : vector<16x16xf32>
    %cst_130 = arith.constant dense<0.000000e+00> : vector<16xf32>
    %301 = vector.multi_reduction <add>, %300, %cst_130 [1] : vector<16x16xf32> to vector<16xf32>
    %302 = vector.shape_cast %301 : vector<16xf32> to vector<16x1xf32>
    %303 = tpu.reciprocal %302 {approx = true} : vector<16x1xf32> -> vector<16x1xf32>
    %304 = vector.broadcast %303 : vector<16x1xf32> to vector<16x16xf32>
    %305 = arith.mulf %300, %304 : vector<16x16xf32>
    %306 = arith.truncf %305 : vector<16x16xf32> to vector<16x16xbf16>
    %cst_131 = arith.constant dense<0.000000e+00> : vector<16x8xf32>
    %307 = tpu.matmul %306, %291, %cst_131 {dimension_numbers = #tpu.dot_dimension_numbers<[1], [0], [0], [1], [0, 0, 1, 1], [], []>} : vector<16x16xbf16>, vector<16x8xbf16>, vector<16x8xf32> -> vector<16x8xf32>
    %308 = tpu.concatenate %250, %269, %288, %307 in 1 : vector<16x8xf32>, vector<16x8xf32>, vector<16x8xf32>, vector<16x8xf32> -> vector<16x32xf32>
    %309 = arith.truncf %308 : vector<16x32xf32> to vector<16x32xbf16>
    %cst_132 = arith.constant dense<0.000000e+00> : vector<16x32xf32>
    %310 = tpu.matmul %309, %206, %cst_132 {dimension_numbers = #tpu.dot_dimension_numbers<[1], [0], [0], [1], [0, 0, 1, 1], [], []>} : vector<16x32xbf16>, vector<32x32xbf16>, vector<16x32xf32> -> vector<16x32xf32>
    %311 = vector.broadcast %214 : vector<1x32xf32> to vector<16x32xf32>
    %312 = arith.addf %310, %311 : vector<16x32xf32>
    %313 = arith.addf %312, %202 : vector<16x32xf32>
    %cst_133 = arith.constant dense<0.000000e+00> : vector<16xf32>
    %314 = vector.multi_reduction <add>, %313, %cst_133 [1] : vector<16x32xf32> to vector<16xf32>
    %315 = vector.shape_cast %314 : vector<16xf32> to vector<16x1xf32>
    %cst_134 = arith.constant 3.200000e+01 : f32
    %316 = vector.broadcast %cst_134 : f32 to vector<16x1xf32>
    %317 = arith.divf %315, %316 : vector<16x1xf32>
    %318 = vector.broadcast %317 : vector<16x1xf32> to vector<16x32xf32>
    %319 = arith.subf %313, %318 : vector<16x32xf32>
    %320 = arith.mulf %319, %319 : vector<16x32xf32>
    %cst_135 = arith.constant dense<0.000000e+00> : vector<16xf32>
    %321 = vector.multi_reduction <add>, %320, %cst_135 [1] : vector<16x32xf32> to vector<16xf32>
    %322 = vector.shape_cast %321 : vector<16xf32> to vector<16x1xf32>
    %cst_136 = arith.constant 3.200000e+01 : f32
    %323 = vector.broadcast %cst_136 : f32 to vector<16x1xf32>
    %324 = arith.divf %322, %323 : vector<16x1xf32>
    %325 = vector.broadcast %317 : vector<16x1xf32> to vector<16x32xf32>
    %326 = arith.subf %313, %325 : vector<16x32xf32>
    %cst_137 = arith.constant 9.99999996E-13 : f32
    %327 = vector.broadcast %cst_137 : f32 to vector<16x1xf32>
    %328 = arith.addf %324, %327 : vector<16x1xf32>
    %329 = math.rsqrt %328 : vector<16x1xf32>
    %330 = vector.broadcast %329 : vector<16x1xf32> to vector<16x32xf32>
    %331 = arith.mulf %326, %330 : vector<16x32xf32>
    %332 = vector.broadcast %216 : vector<1x32xf32> to vector<16x32xf32>
    %333 = arith.mulf %331, %332 : vector<16x32xf32>
    %334 = vector.broadcast %218 : vector<1x32xf32> to vector<16x32xf32>
    %335 = arith.addf %333, %334 : vector<16x32xf32>
    %336 = arith.truncf %335 : vector<16x32xf32> to vector<16x32xbf16>
    %cst_138 = arith.constant dense<0.000000e+00> : vector<16x64xf32>
    %337 = tpu.matmul %336, %208, %cst_138 {dimension_numbers = #tpu.dot_dimension_numbers<[1], [0], [0], [1], [0, 0, 1, 1], [], []>} : vector<16x32xbf16>, vector<32x64xbf16>, vector<16x64xf32> -> vector<16x64xf32>
    %338 = vector.broadcast %220 : vector<1x64xf32> to vector<16x64xf32>
    %339 = arith.addf %337, %338 : vector<16x64xf32>
    %cst_139 = arith.constant 5.000000e-01 : f32
    %340 = vector.broadcast %cst_139 : f32 to vector<16x64xf32>
    %341 = arith.mulf %340, %339 : vector<16x64xf32>
    %cst_140 = arith.constant 4.471500e-02 : f32
    %342 = vector.broadcast %cst_140 : f32 to vector<16x64xf32>
    %343 = arith.mulf %342, %339 : vector<16x64xf32>
    %344 = arith.mulf %343, %339 : vector<16x64xf32>
    %345 = arith.mulf %344, %339 : vector<16x64xf32>
    %346 = arith.addf %339, %345 : vector<16x64xf32>
    %cst_141 = arith.constant 0.797884583 : f32
    %347 = vector.broadcast %cst_141 : f32 to vector<16x64xf32>
    %348 = arith.mulf %347, %346 : vector<16x64xf32>
    %349 = math.tanh %348 : vector<16x64xf32>
    %cst_142 = arith.constant 1.000000e+00 : f32
    %350 = vector.broadcast %cst_142 : f32 to vector<16x64xf32>
    %351 = arith.addf %350, %349 : vector<16x64xf32>
    %352 = arith.mulf %341, %351 : vector<16x64xf32>
    %353 = arith.truncf %352 : vector<16x64xf32> to vector<16x64xbf16>
    %cst_143 = arith.constant dense<0.000000e+00> : vector<16x32xf32>
    %354 = tpu.matmul %353, %210, %cst_143 {dimension_numbers = #tpu.dot_dimension_numbers<[1], [0], [0], [1], [0, 0, 1, 1], [], []>} : vector<16x64xbf16>, vector<64x32xbf16>, vector<16x32xf32> -> vector<16x32xf32>
    %355 = vector.broadcast %222 : vector<1x32xf32> to vector<16x32xf32>
    %356 = arith.addf %354, %355 : vector<16x32xf32>
    %357 = arith.addf %356, %335 : vector<16x32xf32>
    %cst_144 = arith.constant dense<0.000000e+00> : vector<16xf32>
    %358 = vector.multi_reduction <add>, %357, %cst_144 [1] : vector<16x32xf32> to vector<16xf32>
    %359 = vector.shape_cast %358 : vector<16xf32> to vector<16x1xf32>
    %cst_145 = arith.constant 3.200000e+01 : f32
    %360 = vector.broadcast %cst_145 : f32 to vector<16x1xf32>
    %361 = arith.divf %359, %360 : vector<16x1xf32>
    %362 = vector.broadcast %361 : vector<16x1xf32> to vector<16x32xf32>
    %363 = arith.subf %357, %362 : vector<16x32xf32>
    %364 = arith.mulf %363, %363 : vector<16x32xf32>
    %cst_146 = arith.constant dense<0.000000e+00> : vector<16xf32>
    %365 = vector.multi_reduction <add>, %364, %cst_146 [1] : vector<16x32xf32> to vector<16xf32>
    %366 = vector.shape_cast %365 : vector<16xf32> to vector<16x1xf32>
    %cst_147 = arith.constant 3.200000e+01 : f32
    %367 = vector.broadcast %cst_147 : f32 to vector<16x1xf32>
    %368 = arith.divf %366, %367 : vector<16x1xf32>
    %369 = vector.broadcast %361 : vector<16x1xf32> to vector<16x32xf32>
    %370 = arith.subf %357, %369 : vector<16x32xf32>
    %cst_148 = arith.constant 9.99999996E-13 : f32
    %371 = vector.broadcast %cst_148 : f32 to vector<16x1xf32>
    %372 = arith.addf %368, %371 : vector<16x1xf32>
    %373 = math.rsqrt %372 : vector<16x1xf32>
    %374 = vector.broadcast %373 : vector<16x1xf32> to vector<16x32xf32>
    %375 = arith.mulf %370, %374 : vector<16x32xf32>
    %376 = vector.broadcast %224 : vector<1x32xf32> to vector<16x32xf32>
    %377 = arith.mulf %375, %376 : vector<16x32xf32>
    %378 = vector.broadcast %226 : vector<1x32xf32> to vector<16x32xf32>
    %379 = arith.addf %377, %378 : vector<16x32xf32>
    %c0_149 = arith.constant 0 : index
    %c0_150 = arith.constant 0 : index
    %380 = vector.load %arg4[%c0_149, %c0_150] : memref<32x160xbf16, #tpu.memory_space<vmem>>, vector<32x32xbf16>
    %381 = arith.truncf %379 : vector<16x32xf32> to vector<16x32xbf16>
    %cst_151 = arith.constant dense<0.000000e+00> : vector<16x32xf32>
    %382 = tpu.matmul %381, %380, %cst_151 {dimension_numbers = #tpu.dot_dimension_numbers<[1], [0], [0], [1], [0, 0, 1, 1], [], []>} : vector<16x32xbf16>, vector<32x32xbf16>, vector<16x32xf32> -> vector<16x32xf32>
    %c2_152 = arith.constant 2 : index
    %c0_153 = arith.constant 0 : index
    %383 = vector.load %arg5[%c2_152, %c0_153] : memref<4x128xf32, #tpu.memory_space<vmem>>, vector<1x32xf32>
    %384 = vector.broadcast %383 : vector<1x32xf32> to vector<16x32xf32>
    %385 = arith.addf %382, %384 : vector<16x32xf32>
    %386 = math.tanh %385 : vector<16x32xf32>
    %c0_154 = arith.constant 0 : index
    %c32_155 = arith.constant 32 : index
    %387 = vector.load %arg4[%c0_154, %c32_155] : memref<32x160xbf16, #tpu.memory_space<vmem>>, vector<32x128xbf16>
    %388 = arith.truncf %386 : vector<16x32xf32> to vector<16x32xbf16>
    %cst_156 = arith.constant dense<0.000000e+00> : vector<16x128xf32>
    %389 = tpu.matmul %388, %387, %cst_156 {dimension_numbers = #tpu.dot_dimension_numbers<[1], [0], [0], [1], [0, 0, 1, 1], [], []>} : vector<16x32xbf16>, vector<32x128xbf16>, vector<16x128xf32> -> vector<16x128xf32>
    %c3_157 = arith.constant 3 : index
    %c0_158 = arith.constant 0 : index
    %390 = vector.load %arg5[%c3_157, %c0_158] : memref<4x128xf32, #tpu.memory_space<vmem>>, vector<1x128xf32>
    %391 = vector.broadcast %390 : vector<1x128xf32> to vector<16x128xf32>
    %392 = arith.addf %389, %391 : vector<16x128xf32>
    %c0_159 = arith.constant 0 : index
    %c0_160 = arith.constant 0 : index
    %393 = vector.load %arg6[%c0_159, %c0_160] : memref<16x128xf32, #tpu.memory_space<vmem>>, vector<16x128xf32>
    tpu.vector_store %arg6[%c0_159, %c0_160], %392 {strides = array<i32>} : memref<16x128xf32, #tpu.memory_space<vmem>>, vector<16x128xf32>,
    return
  }
}

</mosaic_0001>

<bundles_post_ra>
// kernel: mul.8
= control target key start
LH: loop header
LB: loop body
LE: loop exit
PB: predicated region body
PF: predicated region fallthrough
CT: control target
= control target key end

     0   :  { %vm7_vm0 = vcmask 64512   ;;  %vm13_vm1 = vcmask 130112   ;;  %s39_s0 = inlined_call_operand.vmem [shape: f32[2,8], index: 0, kind: input, shape index: {}]   ;;  %s40_s1 = inlined_call_operand.vmem [shape: f32[16], index: 1, kind: output, shape index: {}]  }
   0x1   :  { %v4_v0 = vld [vmem:[%s39_s0] sm:$0x3]  ;;  %s22_s0 = smov 8  }
   0x2   :  { %5 = vst [vmem:[#allocation1] sm:$0x3] %v4_v0 }
   0x9   :  { %v10_v1 = vld [vmem:[#allocation1 + $0x1] sm:$0x1]   ;;  %v6_v2 = vld [vmem:[#allocation1] sm:$0x1]  }
   0xa   :  { %11 = vrot.lane.b32.xlu0 %v10_v1, %s22_s0  ;;  %8 = vst.msk [vmem:[#allocation0] sm:$0x1] %vm7_vm0, %v6_v2  }
  0x7c   :  { %v12_v3 = vpop.permute.xlu0 %11  }
  0x7d   :  { %14 = vst.msk [vmem:[#allocation0] sm:$0x1] %vm13_vm1, %v12_v3  }
  0x84   :  { %v17_v4 = vld [vmem:[#allocation0] sm:$0x1] }
  0x85   :  { %20 = vst [vmem:[%s40_s1] sm:$0x1] %v17_v4 }

// kernel: bert_classifier_forward.1
= control target key start
LH: loop header
LB: loop body
LE: loop exit
PB: predicated region body
PF: predicated region fallthrough
CT: control target
= control target key end

     0   :  { %vm28_vm0 = vcmask 261120   ;;  %v1748_v4 = vmov 32.0   ;;  %s1749_s10 = smov 72   ;;  %s1750_s11 = smov 120   ;;  %vm156_vm8 = vcmask 64512   ;;  %vm181_vm9 = vcmask 130048   ;;  %s2208_s0 = inlined_call_operand.vmem [shape: f32[16,32], index: 0, kind: input, shape index: {}]   ;;  %s2209_s5 = inlined_call_operand.vmem [shape: f32[4,128], index: 5, kind: input, shape index: {}]   ;;  %s2210_s3 = inlined_call_operand.vmem [shape: f32[2,8,96], index: 3, kind: input, shape index: {}]   ;;  %s2211_s2 = inlined_call_operand.vmem [shape: bf16[2,160,96], index: 2, kind: input, shape index: {}]   ;;  %s2212_s1 = inlined_call_operand.vmem [shape: f32[16,16], index: 1, kind: input, shape index: {}]   ;;  %s2213_s4 = inlined_call_operand.vmem [shape: bf16[32,160], index: 4, kind: input, shape index: {}]   ;;  %s2214_s6 = inlined_call_operand.vmem [shape: f32[16,128], index: 6, kind: output, shape index: {}]  }
   0x1   :  { %v24_v0 = vld [vmem:[%s2208_s0] sm:$0xff]  ;;  %v25_v2 = vld [vmem:[%s2208_s0 + $0x8] sm:$0xff]  ;;  %1650 = vrcp.f32 %v1748_v4  ;;  %s1751_s12 = smov 96   ;;  %s1752_s13 = smov 88   ;;  %vm466_vm10 = vcmask 195584  }
   0x2   :  { %v29_v1 = vsel %vm28_vm0, %v24_v0, 0.0  ;;  %v32_v3 = vsel %vm28_vm0, %v25_v2, 0.0  ;;  %v1560_v21 = vld [vmem:[%s2211_s2 + $0x8] sm:$0xff]  ;;  %v1559_v23 = vld [vmem:[%s2211_s2] sm:$0xff]  ;;  %s1753_s14 = smov 104   ;;  %s1754_s15 = smov 80  }
   0x3   :  { %30 = vadd.xlane.f32.xlu0 %v29_v1  ;;  %139 = vmatpush.bf16.msra.mxu0 %v1560_v21  ;;  %v1630_v42 = vld [vmem:[%s2209_s5] ss:$0 sm:$0xff]  ;;  %v1631_v47 = vld [vmem:[%s2209_s5 + $0x1] ss:$0 sm:$0xff]  ;;  %s1755_s16 = smov 112   ;;  %s1757_s21 = smov 56  }
   0x4   :  { %v1632_v53 = vld [vmem:[%s2210_s3] ss:$0 sm:$0xff]  ;;  %s1758_s22 = smov 40   ;;  %s1759_s23 = smov 48  }
   0x5   :  { %s1760_s24 = smov 8   ;;  %s1761_s0 = smov 24  }
   0x6   :  { %s1762_s25 = smov 16  }
   0x7   :  { %v1651_v5 = vpop.eup %1650  ;;  %140 = vmatpush.bf16.msra.mxu0 %v1559_v23 }
   0x8   :  { %v36_v6 = vmul.f32 32.0, %v1651_v5  ;;  %vm40_vm1 = vweird.f32 %v1651_v5 }
   0xa   :  { %v37_v7 = vsub.f32 1.0, %v36_v6 }
   0xb   :  { %33 = vadd.xlane.f32.xlu0 %v32_v3 }
   0xc   :  { %v38_v8 = vmul.f32 %v1651_v5, %v37_v7 }
   0xe   :  { %v39_v9 = vadd.f32 %v1651_v5, %v38_v8 }
  0x10   :  { %v1806_v10 = vsel %vm40_vm1, %v1651_v5, %v39_v9 }
  0x76   :  { %v31_v11 = vpop.xlane.xlu0 %30 }
  0x77   :  { %v42_v12 = vmul.f32 %v1806_v10, %v31_v11  ;;  %v1864_v11 = vld [vmem:[%s2212_s1] sm:$0xff] }
  0x79   :  { %v44_v13 = vsub.f32 %v24_v0, %v42_v12 }
  0x7b   :  { %v46_v14 = vmul.f32 %v44_v13, %v44_v13 }
  0x7d   :  { %v48_v15 = vsel %vm28_vm0, %v46_v14, 0.0 }
  0x7e   :  { %49 = vadd.xlane.f32.xlu1 %v48_v15  ;;  %v34_v16 = vpop.xlane.xlu0 %33 }
  0x7f   :  { %v43_v17 = vmul.f32 %v1806_v10, %v34_v16  ;;  %v1871_v16 = vld [vmem:[%s2212_s1 + $0x8] sm:$0xff]  ;;  %s1756_s1 = smov 64  }
  0x81   :  { %v45_v18 = vsub.f32 %v25_v2, %v43_v17 }
  0x83   :  { %v47_v19 = vmul.f32 %v45_v18, %v45_v18 }
  0x85   :  { %v51_v20 = vsel %vm28_vm0, %v47_v19, 0.0 }
  0x86   :  { %52 = vadd.xlane.f32.xlu1 %v51_v20 }
  0xf1   :  { %v50_v22 = vpop.xlane.xlu1 %49 }
  0xf2   :  { %v54_v24 = vmul.f32 %v50_v22, %v1806_v10 }
  0xf4   :  { %v56_v25 = vadd.f32 1e-12, %v54_v24 }
  0xf6   :  { %1652 = vrsqrt.f32 %v56_v25  ;;  %vm64_vm3 = vweird.f32 %v56_v25 }
  0xf9   :  { %v53_v26 = vpop.xlane.xlu1 %52 }
  0xfa   :  { %v55_v27 = vmul.f32 %v53_v26, %v1806_v10 }
  0xfc   :  { %v1653_v28 = vpop.eup %1652  ;;  %v57_v29 = vadd.f32 1e-12, %v55_v27 }
  0xfd   :  { %v59_v30 = vmul.f32 %v1653_v28, %v56_v25  ;;  %vm65_vm2 = vweird.f32 %v1653_v28 }
  0xfe   :  { %1654 = vrsqrt.f32 %v57_v29  ;;  %vm66_vm4 = vmor %vm64_vm3, %vm65_vm2  ;;  %vm74_vm6 = vweird.f32 %v57_v29  ;;  %vm627_vm2 = vcmask 523264  }
  0xff   :  { %v60_v31 = vmul.f32 %v1653_v28, %v59_v30 }
 0x101   :  { %v61_v32 = vmul.f32 0.5, %v60_v31 }
 0x103   :  { %v62_v33 = vsub.f32 1.5, %v61_v32 }
 0x104   :  { %v1655_v34 = vpop.eup %1654 }
 0x105   :  { %v63_v35 = vmul.f32 %v1653_v28, %v62_v33  ;;  %v69_v36 = vmul.f32 %v1655_v34, %v57_v29  ;;  %vm75_vm5 = vweird.f32 %v1655_v34 }
 0x106   :  { %vm76_vm7 = vmor %vm74_vm6, %vm75_vm5 }
 0x107   :  { %v70_v37 = vmul.f32 %v1655_v34, %v69_v36  ;;  %v67_v38 = vsel %vm66_vm4, %v1653_v28, %v63_v35 }
 0x108   :  { %v78_v41 = vmul.f32 %v67_v38, %v44_v13 }
 0x109   :  { %v71_v39 = vmul.f32 0.5, %v70_v37 }
 0x10a   :  { %v81_v46 = vmul.f32 %v1630_v42, %v78_v41 }
 0x10b   :  { %v72_v40 = vsub.f32 1.5, %v71_v39 }
 0x10c   :  { %v1826_v49 = vadd.f32 %v1631_v47, %v81_v46 }
 0x10d   :  { %v73_v43 = vmul.f32 %v1655_v34, %v72_v40 }
 0x10f   :  { %v77_v44 = vsel %vm76_vm7, %v1655_v34, %v73_v43 }
 0x110   :  { %v79_v45 = vmul.f32 %v77_v44, %v45_v18 }
 0x112   :  { %v82_v48 = vmul.f32 %v1630_v42, %v79_v45 }
 0x114   :  { %v1828_v50 = vadd.f32 %v1631_v47, %v82_v48 }
 0x116   :  { %v116_v51 = vpack.c.bf16 %v1828_v50, %v1826_v49 }
 0x118   :  { %1409 = vmatmul.msk.bf16.vlgmr.msra.gmra.mxu0 %vm28_vm0, %v116_v51 }
 0x195   :  { %v142_v52 = vpop.f32.mrf.mxu0 }
 0x196   :  { %v143_v54 = vadd.f32 %v1632_v53, %v142_v52 }
 0x198   :  { %v147_v56 = vpack.c.bf16 %v143_v54, %v143_v54 }
 0x19a   :  { %v151_v59 = vunpack.c.l.b16 %v147_v56 }
 0x19d   :  { %v144_v55 = vpop.f32.mrf.mxu0 }
 0x19e   :  { %v145_v57 = vadd.f32 %v1632_v53, %v144_v55 }
 0x1a0   :  { %v148_v58 = vpack.c.bf16 %v145_v57, %v145_v57 }
 0x1a2   :  { %v152_v60 = vunpack.c.l.b16 %v148_v58 }
 0x1a4   :  { %v1836_v61 = vpack.c.b16 %v152_v60, %v151_v59 }
 0x1a6   :  { %369 = vrot.lane.b32.xlu1 %v1836_v61, %s1749_s10  ;;  %225 = vrot.lane.b32.xlu0 %v1836_v61, %s1750_s11 }
 0x1a7   :  { %154 = vrot.lane.b32.xlu2 %v1836_v61, %s1751_s12 }
 0x1af   :  { %227 = vrot.lane.b32.xlu2 %v1836_v61, %s1752_s13 }
 0x1b7   :  { %367 = vrot.lane.b32.xlu2 %v1836_v61, %s1753_s14 }
 0x1bf   :  { %298 = vrot.lane.b32.xlu2 %v1836_v61, %s1754_s15 }
 0x1c7   :  { %296 = vrot.lane.b32.xlu2 %v1836_v61, %s1755_s16 }
 0x201   :  { %v155_v62 = vpop.permute.xlu2 %154 }
 0x202   :  { %v161_v63 = vsel %vm156_vm8, %v155_v62, 0 }
 0x203   :  { %170 = vmatpush.bf16.xpose.msra.mxu1 %v161_v63 }
 0x209   :  { %v228_v0 = vpop.permute.xlu2 %227 }
 0x20a   :  { %1410 = vmatmul.msk.bf16.vlgmr.msra.gmra.mxu1 %vm156_vm8, %v1836_v61  ;;  %v233_v1 = vsel %vm156_vm8, %v228_v0, 0 }
 0x20b   :  { %242 = vmatpush.bf16.xpose.msra.mxu3 %v233_v1 }
 0x211   :  { %v368_v2 = vpop.permute.xlu2 %367 }
 0x218   :  { %v370_v3 = vpop.permute.xlu1 %369  ;;  %v226_v4 = vpop.permute.xlu0 %225 }
 0x219   :  { %v299_v5 = vpop.permute.xlu2 %298  ;;  %1412 = vmatmul.msk.bf16.vlgmr.msra.gmra.mxu3 %vm156_vm8, %v226_v4  ;;  %v375_v6 = vsel %vm156_vm8, %v370_v3, 0 }
 0x21a   :  { %v304_v7 = vsel %vm156_vm8, %v299_v5, 0  ;;  %384 = vmatpush.bf16.xpose.msrb.mxu3 %v375_v6 }
 0x21b   :  { %313 = vmatpush.bf16.xpose.msrb.mxu0 %v304_v7 }
 0x221   :  { %v297_v8 = vpop.permute.xlu2 %296 }
 0x222   :  { %1414 = vmatmul.msk.bf16.vlgmr.msrb.gmra.mxu0 %vm156_vm8, %v297_v8 }
 0x229   :  { %1416 = vmatmul.msk.bf16.vlgmr.msrb.gmra.mxu3 %vm156_vm8, %v368_v2 }
 0x287   :  { %v172_v9 = vpop.f32.mrf.mxu1 }
 0x288   :  { %v177_v12 = vmul.f32 0.35355338, %v172_v9 }
 0x28a   :  { %v179_v13 = vadd.f32 %v177_v12, %v1864_v11 }
 0x28c   :  { %v182_v14 = vsel %vm181_vm9, %v179_v13, -inf }
 0x28d   :  { %183 = vmax.xlane.f32.xlu0 %v182_v14 }
 0x28f   :  { %v174_v15 = vpop.f32.mrf.mxu1 }
 0x290   :  { %v178_v17 = vmul.f32 0.35355338, %v174_v15 }
 0x292   :  { %v180_v18 = vadd.f32 %v178_v17, %v1871_v16 }
 0x294   :  { %v185_v19 = vsel %vm181_vm9, %v180_v18, -inf }
 0x295   :  { %186 = vmax.xlane.f32.xlu2 %v185_v19 }
 0x29c   :  { %v244_v20 = vpop.f32.mrf.mxu3 }
 0x29d   :  { %v249_v21 = vmul.f32 0.35355338, %v244_v20 }
 0x29f   :  { %v315_v22 = vpop.f32.mrf.mxu0  ;;  %v251_v23 = vadd.f32 %v249_v21, %v1864_v11 }
 0x2a0   :  { %v320_v24 = vmul.f32 0.35355338, %v315_v22 }
 0x2a1   :  { %v253_v25 = vsel %vm181_vm9, %v251_v23, -inf }
 0x2a2   :  { %254 = vmax.xlane.f32.xlu1 %v253_v25  ;;  %v322_v26 = vadd.f32 %v320_v24, %v1864_v11 }
 0x2a4   :  { %v246_v27 = vpop.f32.mrf.mxu3  ;;  %v324_v28 = vsel %vm181_vm9, %v322_v26, -inf }
 0x2a5   :  { %v250_v29 = vmul.f32 0.35355338, %v246_v27  ;;  %325 = vmax.xlane.f32.xlu0 %v324_v28 }
 0x2a7   :  { %v317_v30 = vpop.f32.mrf.mxu0  ;;  %v252_v32 = vadd.f32 %v250_v29, %v1871_v16 }
 0x2a8   :  { %v321_v31 = vmul.f32 0.35355338, %v317_v30 }
 0x2a9   :  { %v256_v35 = vsel %vm181_vm9, %v252_v32, -inf }
 0x2aa   :  { %v323_v33 = vadd.f32 %v321_v31, %v1871_v16 }
 0x2ac   :  { %v386_v34 = vpop.f32.mrf.mxu3  ;;  %v327_v36 = vsel %vm181_vm9, %v323_v33, -inf }
 0x2ad   :  { %v391_v37 = vmul.f32 0.35355338, %v386_v34  ;;  %257 = vmax.xlane.f32.xlu0 %v256_v35  ;;  %328 = vmax.xlane.f32.xlu2 %v327_v36 }
 0x2af   :  { %v393_v38 = vadd.f32 %v391_v37, %v1864_v11 }
 0x2b1   :  { %v395_v40 = vsel %vm181_vm9, %v393_v38, -inf }
 0x2b4   :  { %v388_v39 = vpop.f32.mrf.mxu3 }
 0x2b5   :  { %v392_v41 = vmul.f32 0.35355338, %v388_v39  ;;  %396 = vmax.xlane.f32.xlu2 %v395_v40 }
 0x2b7   :  { %v394_v42 = vadd.f32 %v392_v41, %v1871_v16 }
 0x2b9   :  { %v398_v43 = vsel %vm181_vm9, %v394_v42, -inf }
 0x2ba   :  { %399 = vmax.xlane.f32.xlu1 %v398_v43 }
 0x2cd   :  { %205 = vrot.lane.b32.xlu2 %v1836_v61, %s1756_s1 }
 0x2d3   :  { %276 = vrot.lane.b32.xlu1 %v1836_v61, %s1757_s21 }
 0x300   :  { %v184_v44 = vpop.xlane.xlu0 %183 }
 0x301   :  { %v188_v45 = vsub.f32 %v179_v13, %v184_v44 }
 0x303   :  { %v190_v46 = vmul.f32 1.442695, %v188_v45 }
 0x305   :  { %1656 = vpow2.f32 %v190_v46 }
 0x308   :  { %v187_v47 = vpop.xlane.xlu2 %186 }
 0x309   :  { %v189_v48 = vsub.f32 %v180_v18, %v187_v47 }
 0x30b   :  { %v1891_v51 = vpop.eup %1656  ;;  %v192_v52 = vmul.f32 1.442695, %v189_v48 }
 0x30c   :  { %v194_v53 = vsel %vm181_vm9, %v1891_v51, 0.0 }
 0x30d   :  { %1658 = vpow2.f32 %v192_v52  ;;  %195 = vadd.xlane.f32.xlu1 %v194_v53 }
 0x313   :  { %v1659_v54 = vpop.eup %1658 }
 0x314   :  { %v197_v55 = vsel %vm181_vm9, %v1659_v54, 0.0 }
 0x315   :  { %198 = vadd.xlane.f32.xlu0 %v197_v55  ;;  %v255_v56 = vpop.xlane.xlu1 %254 }
 0x316   :  { %v259_v57 = vsub.f32 %v251_v23, %v255_v56 }
 0x318   :  { %v261_v58 = vmul.f32 1.442695, %v259_v57  ;;  %v326_v59 = vpop.xlane.xlu0 %325 }
 0x319   :  { %v330_v60 = vsub.f32 %v322_v26, %v326_v59 }
 0x31a   :  { %1660 = vpow2.f32 %v261_v58 }
 0x31b   :  { %v332_v62 = vmul.f32 1.442695, %v330_v60 }
 0x31d   :  { %1662 = vpow2.f32 %v332_v62 }
 0x320   :  { %v1661_v63 = vpop.eup %1660  ;;  %v329_v0 = vpop.xlane.xlu2 %328 }
 0x321   :  { %v258_v1 = vpop.xlane.xlu0 %257  ;;  %v331_v2 = vsub.f32 %v323_v33, %v329_v0  ;;  %v265_v3 = vsel %vm181_vm9, %v1661_v63, 0.0 }
 0x322   :  { %266 = vadd.xlane.f32.xlu1 %v265_v3  ;;  %v260_v6 = vsub.f32 %v252_v32, %v258_v1 }
 0x323   :  { %v1897_v4 = vpop.eup %1662  ;;  %v334_v5 = vmul.f32 1.442695, %v331_v2 }
 0x324   :  { %v336_v7 = vsel %vm181_vm9, %v1897_v4, 0.0  ;;  %v263_v8 = vmul.f32 1.442695, %v260_v6 }
 0x325   :  { %337 = vadd.xlane.f32.xlu2 %v336_v7  ;;  %1664 = vpow2.f32 %v334_v5  ;;  %v1562_v7 = vld [vmem:[%s2211_s2 + $0x18] sm:$0xff] }
 0x326   :  { %1666 = vpow2.f32 %v263_v8  ;;  %492 = vmatpush.bf16.msra.mxu0 %v1562_v7  ;;  %v1561_v8 = vld [vmem:[%s2211_s2 + $0x10] sm:$0xff]  ;;  %v1635_v7 = vld [vmem:[%s2210_s3 + $0x3] ss:$0 sm:$0xff] }
 0x328   :  { %v397_v9 = vpop.xlane.xlu2 %396 }
 0x329   :  { %v401_v13 = vsub.f32 %v393_v38, %v397_v9 }
 0x32a   :  { %493 = vmatpush.bf16.msra.mxu0 %v1561_v8 }
 0x32b   :  { %v1901_v12 = vpop.eup %1664  ;;  %v403_v15 = vmul.f32 1.442695, %v401_v13 }
 0x32c   :  { %v339_v14 = vsel %vm181_vm9, %v1901_v12, 0.0  ;;  %v1667_v19 = vpop.eup %1666 }
 0x32d   :  { %340 = vadd.xlane.f32.xlu0 %v339_v14  ;;  %v400_v18 = vpop.xlane.xlu1 %399  ;;  %1668 = vpow2.f32 %v403_v15  ;;  %v268_v21 = vsel %vm181_vm9, %v1667_v19, 0.0 }
 0x32e   :  { %v402_v20 = vsub.f32 %v394_v42, %v400_v18 }
 0x330   :  { %v206_v17 = vpop.permute.xlu2 %205  ;;  %v405_v22 = vmul.f32 1.442695, %v402_v20 }
 0x331   :  { %218 = vmatpush.bf16.msra.mxu2 %v206_v17 }
 0x332   :  { %1670 = vpow2.f32 %v405_v22 }
 0x333   :  { %v1669_v23 = vpop.eup %1668 }
 0x334   :  { %v407_v24 = vsel %vm181_vm9, %v1669_v23, 0.0 }
 0x335   :  { %269 = vadd.xlane.f32.xlu0 %v268_v21 }
 0x338   :  { %v1671_v25 = vpop.eup %1670 }
 0x339   :  { %v410_v26 = vsel %vm181_vm9, %v1671_v25, 0.0 }
 0x33b   :  { %418 = vrot.lane.b32.xlu1 %v1836_v61, %s1758_s22 }
 0x33d   :  { %408 = vadd.xlane.f32.xlu0 %v407_v24 }
 0x345   :  { %v277_v27 = vpop.permute.xlu1 %276  ;;  %411 = vadd.xlane.f32.xlu0 %v410_v26 }
 0x346   :  { %289 = vmatpush.bf16.msrb.mxu2 %v277_v27 }
 0x359   :  { %347 = vrot.lane.b32.xlu0 %v1836_v61, %s1759_s23 }
 0x380   :  { %v196_v28 = vpop.xlane.xlu1 %195 }
 0x381   :  { %1672 = vrcp.f32 %v196_v28  ;;  %v1633_v28 = vld [vmem:[%s2210_s3 + $0x1] ss:$0 sm:$0xff] }
 0x387   :  { %v1673_v30 = vpop.eup %1672 }
 0x388   :  { %v199_v29 = vpop.xlane.xlu0 %198  ;;  %v202_v32 = vmul.f32 %v1673_v30, %v1891_v51 }
 0x389   :  { %1674 = vrcp.f32 %v199_v29 }
 0x38f   :  { %v1675_v31 = vpop.eup %1674 }
 0x390   :  { %v203_v33 = vmul.f32 %v1675_v31, %v1659_v54 }
 0x392   :  { %v204_v34 = vpack.c.bf16 %v203_v33, %v202_v32 }
 0x394   :  { %1411 = vmatmul.msk.bf16.vlgmr.msra.gmra.mxu2 %vm181_vm9, %v204_v34 }
 0x395   :  { %v267_v36 = vpop.xlane.xlu1 %266 }
 0x396   :  { %1676 = vrcp.f32 %v267_v36 }
 0x398   :  { %v338_v47 = vpop.xlane.xlu2 %337 }
 0x39c   :  { %v1677_v39 = vpop.eup %1676 }
 0x39d   :  { %v273_v40 = vmul.f32 %v1677_v39, %v1661_v63 }
 0x3a0   :  { %v341_v35 = vpop.xlane.xlu0 %340 }
 0x3a8   :  { %v270_v37 = vpop.xlane.xlu0 %269 }
 0x3a9   :  { %1678 = vrcp.f32 %v270_v37 }
 0x3ad   :  { %v419_v38 = vpop.permute.xlu1 %418 }
 0x3ae   :  { %431 = vmatpush.bf16.msra.mxu2 %v419_v38 }
 0x3af   :  { %v1679_v61 = vpop.eup %1678 }
 0x3b0   :  { %v274_v41 = vmul.f32 %v1679_v61, %v1667_v19  ;;  %v409_v42 = vpop.xlane.xlu0 %408 }
 0x3b1   :  { %1680 = vrcp.f32 %v409_v42 }
 0x3b2   :  { %v275_v43 = vpack.c.bf16 %v274_v41, %v273_v40 }
 0x3b4   :  { %1413 = vmatmul.msk.bf16.vlgmr.msrb.gmra.mxu2 %vm181_vm9, %v275_v43 }
 0x3b7   :  { %v1681_v45 = vpop.eup %1680 }
 0x3b8   :  { %v412_v44 = vpop.xlane.xlu0 %411  ;;  %v415_v48 = vmul.f32 %v1681_v45, %v1669_v23 }
 0x3b9   :  { %1682 = vrcp.f32 %v412_v44 }
 0x3ba   :  { %1684 = vrcp.f32 %v341_v35 }
 0x3bb   :  { %1686 = vrcp.f32 %v338_v47  ;;  %v1563_v47 = vld [vmem:[%s2211_s2 + $0x20] sm:$0xff] }
 0x3bf   :  { %v1683_v46 = vpop.eup %1682 }
 0x3c0   :  { %v416_v51 = vmul.f32 %v1683_v46, %v1671_v25  ;;  %v1685_v53 = vpop.eup %1684 }
 0x3c1   :  { %v1687_v54 = vpop.eup %1686  ;;  %v345_v55 = vmul.f32 %v1685_v53, %v1901_v12 }
 0x3c2   :  { %v417_v52 = vpack.c.bf16 %v416_v51, %v415_v48  ;;  %v344_v56 = vmul.f32 %v1687_v54, %v1897_v4 }
 0x3c4   :  { %1417 = vmatmul.msk.bf16.vlgmr.msra.gmra.mxu2 %vm181_vm9, %v417_v52  ;;  %v346_v58 = vpack.c.bf16 %v345_v55, %v344_v56 }
 0x3cb   :  { %v348_v57 = vpop.permute.xlu0 %347 }
 0x3cc   :  { %360 = vmatpush.bf16.msrb.mxu1 %v348_v57 }
 0x3cf   :  { %1415 = vmatmul.msk.bf16.vlgmr.msrb.gmra.mxu1 %vm181_vm9, %v346_v58 }
 0x417   :  { %v220_v59 = vpop.f32.mrf.mxu2 }
 0x41f   :  { %v222_v60 = vpop.f32.mrf.mxu2 }
 0x437   :  { %v291_v62 = vpop.f32.mrf.mxu2 }
 0x43f   :  { %v293_v63 = vpop.f32.mrf.mxu2 }
 0x440   :  { %v1600_v0 = vpack.i.bf16 %v293_v63, %v291_v62 }
 0x442   :  { %1601 = vrot.lane.b32.xlu1 %v1600_v0, %s1760_s24 }
 0x447   :  { %v433_v1 = vpop.f32.mrf.mxu2 }
 0x44c   :  { %v362_v2 = vpop.f32.mrf.mxu1 }
 0x44f   :  { %v435_v3 = vpop.f32.mrf.mxu2 }
 0x450   :  { %v1610_v5 = vpack.i.bf16 %v435_v3, %v433_v1  ;;  %v1634_v3 = vld [vmem:[%s2210_s3 + $0x2] ss:$0 sm:$0xff] }
 0x452   :  { %1611 = vrot.lane.b32.xlu0 %v1610_v5, %s1761_s0 }
 0x454   :  { %v364_v4 = vpop.f32.mrf.mxu1 }
 0x455   :  { %v1605_v6 = vpack.i.bf16 %v364_v4, %v362_v2 }
 0x457   :  { %1606 = vrot.lane.b32.xlu1 %v1605_v6, %s1762_s25 }
 0x4b4   :  { %v1602_v9 = vpop.permute.xlu1 %1601 }
 0x4b5   :  { %v1604_v12 = vunpack.i.h.bf16 %v1602_v9  ;;  %v1603_v13 = vunpack.i.l.bf16 %v1602_v9 }
 0x4b7   :  { %v463_v19 = vsel %vm156_vm8, %v222_v60, %v1604_v12  ;;  %v462_v20 = vsel %vm156_vm8, %v220_v59, %v1603_v13 }
 0x4c4   :  { %v1612_v14 = vpop.permute.xlu0 %1611 }
 0x4c5   :  { %v1614_v21 = vunpack.i.h.bf16 %v1612_v14  ;;  %v1613_v22 = vunpack.i.l.bf16 %v1612_v14 }
 0x4c9   :  { %v1607_v15 = vpop.permute.xlu1 %1606 }
 0x4ca   :  { %v1609_v17 = vunpack.i.h.bf16 %v1607_v15  ;;  %v1608_v18 = vunpack.i.l.bf16 %v1607_v15 }
 0x4cc   :  { %v465_v23 = vsel %vm181_vm9, %v463_v19, %v1609_v17  ;;  %v464_v24 = vsel %vm181_vm9, %v462_v20, %v1608_v18  ;;  %v1568_v17 = vld [vmem:[%s2211_s2 + $0x48] sm:$0xff]  ;;  %v1567_v18 = vld [vmem:[%s2211_s2 + $0x40] sm:$0xff]  ;;  %v1566_v19 = vld [vmem:[%s2211_s2 + $0x38] sm:$0xff] }
 0x4cd   :  { %v468_v25 = vsel %vm466_vm10, %v465_v23, %v1614_v21  ;;  %v467_v26 = vsel %vm466_vm10, %v464_v24, %v1613_v22  ;;  %635 = vmatpush.bf16.msra.mxu3 %v1568_v17  ;;  %v1565_v20 = vld [vmem:[%s2211_s2 + $0x30] sm:$0xff]  ;;  %v1636_v21 = vld [vmem:[%s2210_s3 + $0x4] ss:$0 sm:$0xff] }
 0x4ce   :  { %v469_v27 = vpack.c.bf16 %v468_v25, %v467_v26 }
 0x4d0   :  { %1426 = vmatmul.msk.bf16.vlgmr.msra.gmra.mxu0 %vm28_vm0, %v469_v27 }
 0x4d1   :  { %636 = vmatpush.bf16.msra.mxu3 %v1567_v18 }
 0x4d5   :  { %637 = vmatpush.bf16.msra.mxu3 %v1566_v19 }
 0x4d9   :  { %638 = vmatpush.bf16.msra.mxu3 %v1565_v20 }
 0x54d   :  { %v495_v29 = vpop.f32.mrf.mxu0 }
 0x54e   :  { %v496_v30 = vadd.f32 %v1633_v28, %v495_v29 }
 0x550   :  { %v500_v31 = vadd.f32 %v496_v30, %v1826_v49 }
 0x552   :  { %v502_v32 = vsel %vm28_vm0, %v500_v31, 0.0 }
 0x553   :  { %503 = vadd.xlane.f32.xlu1 %v502_v32 }
 0x555   :  { %v497_v33 = vpop.f32.mrf.mxu0 }
 0x556   :  { %v498_v34 = vadd.f32 %v1633_v28, %v497_v33 }
 0x558   :  { %v501_v35 = vadd.f32 %v498_v34, %v1828_v50  ;;  %v1564_v50 = vld [vmem:[%s2211_s2 + $0x28] sm:$0xff] }
 0x559   :  { %575 = vmatpush.bf16.msra.mxu1 %v1564_v50 }
 0x55a   :  { %v505_v36 = vsel %vm28_vm0, %v501_v35, 0.0 }
 0x55b   :  { %506 = vadd.xlane.f32.xlu0 %v505_v36 }
 0x55d   :  { %576 = vmatpush.bf16.msra.mxu1 %v1563_v47 }
 0x5c6   :  { %v504_v37 = vpop.xlane.xlu1 %503 }
 0x5c7   :  { %v508_v38 = vmul.f32 %v504_v37, %v1806_v10 }
 0x5c9   :  { %v510_v39 = vsub.f32 %v500_v31, %v508_v38 }
 0x5cb   :  { %v512_v61 = vmul.f32 %v510_v39, %v510_v39 }
 0x5cd   :  { %v514_v40 = vsel %vm28_vm0, %v512_v61, 0.0 }
 0x5ce   :  { %v507_v41 = vpop.xlane.xlu0 %506  ;;  %515 = vadd.xlane.f32.xlu2 %v514_v40 }
 0x5cf   :  { %v509_v49 = vmul.f32 %v507_v41, %v1806_v10 }
 0x5d1   :  { %v511_v42 = vsub.f32 %v501_v35, %v509_v49 }
 0x5d3   :  { %v513_v43 = vmul.f32 %v511_v42, %v511_v42 }
 0x5d5   :  { %v517_v44 = vsel %vm28_vm0, %v513_v43, 0.0  ;;  %v1637_v43 = vld [vmem:[%s2210_s3 + $0x5] ss:$0 sm:$0xff] }
 0x5d6   :  { %518 = vadd.xlane.f32.xlu2 %v517_v44 }
 0x641   :  { %v516_v45 = vpop.xlane.xlu2 %515 }
 0x642   :  { %v520_v46 = vmul.f32 %v516_v45, %v1806_v10 }
 0x644   :  { %v522_v48 = vadd.f32 1e-12, %v520_v46 }
 0x646   :  { %1688 = vrsqrt.f32 %v522_v48  ;;  %vm530_vm12 = vweird.f32 %v522_v48 }
 0x649   :  { %v519_v51 = vpop.xlane.xlu2 %518 }
 0x64a   :  { %v521_v52 = vmul.f32 %v519_v51, %v1806_v10 }
 0x64c   :  { %v1689_v53 = vpop.eup %1688  ;;  %v523_v54 = vadd.f32 1e-12, %v521_v52 }
 0x64d   :  { %v525_v55 = vmul.f32 %v1689_v53, %v522_v48  ;;  %vm531_vm11 = vweird.f32 %v1689_v53 }
 0x64e   :  { %1690 = vrsqrt.f32 %v523_v54  ;;  %vm532_vm13 = vmor %vm530_vm12, %vm531_vm11  ;;  %vm540_vm15 = vweird.f32 %v523_v54 }
 0x64f   :  { %v526_v56 = vmul.f32 %v1689_v53, %v525_v55 }
 0x651   :  { %v527_v57 = vmul.f32 0.5, %v526_v56 }
 0x653   :  { %v528_v58 = vsub.f32 1.5, %v527_v57 }
 0x654   :  { %v1691_v59 = vpop.eup %1690 }
 0x655   :  { %v529_v60 = vmul.f32 %v1689_v53, %v528_v58  ;;  %v535_v62 = vmul.f32 %v1691_v59, %v523_v54  ;;  %vm541_vm14 = vweird.f32 %v1691_v59 }
 0x656   :  { %vm542_vm1 = vmor %vm540_vm15, %vm541_vm14 }
 0x657   :  { %v536_v63 = vmul.f32 %v1691_v59, %v535_v62  ;;  %v533_v0 = vsel %vm532_vm13, %v1689_v53, %v529_v60 }
 0x658   :  { %v544_v5 = vmul.f32 %v533_v0, %v510_v39  ;;  %v1570_v0 = vld [vmem:[%s2211_s2 + $0x58] sm:$0xff] }
 0x659   :  { %v537_v1 = vmul.f32 0.5, %v536_v63  ;;  %750 = vmatpush.bf16.msrb.mxu2 %v1570_v0 }
 0x65a   :  { %v547_v8 = vmul.f32 %v1634_v3, %v544_v5 }
 0x65b   :  { %v538_v2 = vsub.f32 1.5, %v537_v1 }
 0x65c   :  { %v550_v13 = vadd.f32 %v1635_v7, %v547_v8 }
 0x65d   :  { %v539_v4 = vmul.f32 %v1691_v59, %v538_v2 }
 0x65f   :  { %v543_v6 = vsel %vm542_vm1, %v1691_v59, %v539_v4 }
 0x660   :  { %v545_v9 = vmul.f32 %v543_v6, %v511_v42 }
 0x662   :  { %v548_v12 = vmul.f32 %v1634_v3, %v545_v9  ;;  %v1569_v3 = vld [vmem:[%s2211_s2 + $0x50] sm:$0xff] }
 0x663   :  { %751 = vmatpush.bf16.msrb.mxu2 %v1569_v3 }
 0x664   :  { %v551_v14 = vadd.f32 %v1635_v7, %v548_v12 }
 0x666   :  { %v552_v15 = vpack.c.bf16 %v551_v14, %v550_v13 }
 0x668   :  { %1435 = vmatmul.msk.bf16.vlgmr.msra.gmra.mxu1 %vm28_vm0, %v552_v15 }
 0x6e5   :  { %v578_v22 = vpop.f32.mrf.mxu1 }
 0x6e6   :  { %v579_v23 = vadd.f32 %v1636_v21, %v578_v22 }
 0x6e8   :  { %v585_v24 = vmul.f32 0.044715, %v579_v23  ;;  %v583_v39 = vmul.f32 0.5, %v579_v23 }
 0x6ea   :  { %v587_v25 = vmul.f32 %v585_v24, %v579_v23 }
 0x6ec   :  { %v589_v26 = vmul.f32 %v587_v25, %v579_v23 }
 0x6ed   :  { %v580_v27 = vpop.f32.mrf.mxu1 }
 0x6ee   :  { %v591_v28 = vadd.f32 %v589_v26, %v579_v23  ;;  %v581_v29 = vadd.f32 %v1636_v21, %v580_v27  ;;  %v1638_v23 = vld [vmem:[%s2210_s3 + $0x6] ss:$0 sm:$0xff]  ;;  %v1639_v27 = vld [vmem:[%s2210_s3 + $0x7] ss:$0 sm:$0xff] }
 0x6f0   :  { %v586_v30 = vmul.f32 0.044715, %v581_v29  ;;  %v593_v31 = vmul.f32 0.7978846, %v591_v28  ;;  %v584_v61 = vmul.f32 0.5, %v581_v29 }
 0x6f2   :  { %v588_v32 = vmul.f32 %v586_v30, %v581_v29  ;;  %1692 = vtanh.f32 %v593_v31 }
 0x6f4   :  { %v590_v33 = vmul.f32 %v588_v32, %v581_v29 }
 0x6f6   :  { %v592_v34 = vadd.f32 %v590_v33, %v581_v29 }
 0x6f8   :  { %v594_v35 = vmul.f32 0.7978846, %v592_v34  ;;  %v1693_v36 = vpop.eup %1692 }
 0x6f9   :  { %v597_v37 = vadd.f32 1.0, %v1693_v36 }
 0x6fa   :  { %1694 = vtanh.f32 %v594_v35  ;;  %v1640_v35 = vld [vmem:[%s2210_s3 + $0x8] ss:$0 sm:$0xff] }
 0x6fb   :  { %v599_v41 = vmul.f32 %v597_v37, %v583_v39 }
 0x700   :  { %v1695_v38 = vpop.eup %1694 }
 0x701   :  { %v598_v40 = vadd.f32 1.0, %v1695_v38 }
 0x703   :  { %v600_v49 = vmul.f32 %v598_v40, %v584_v61 }
 0x705   :  { %v601_v42 = vpack.c.bf16 %v600_v49, %v599_v41 }
 0x707   :  { %1452 = vmatmul.msk.bf16.vlgmr.msra.gmra.mxu3 %vm627_vm2, %v601_v42 }
 0x78a   :  { %v640_v44 = vpop.f32.mrf.mxu3 }
 0x78b   :  { %v641_v50 = vadd.f32 %v1637_v43, %v640_v44 }
 0x78d   :  { %v645_v45 = vadd.f32 %v641_v50, %v550_v13 }
 0x78f   :  { %v647_v46 = vsel %vm28_vm0, %v645_v45, 0.0 }
 0x790   :  { %648 = vadd.xlane.f32.xlu2 %v647_v46 }
 0x792   :  { %v642_v47 = vpop.f32.mrf.mxu3 }
 0x793   :  { %v643_v48 = vadd.f32 %v1637_v43, %v642_v47 }
 0x795   :  { %v646_v51 = vadd.f32 %v643_v48, %v551_v14 }
 0x797   :  { %v650_v52 = vsel %vm28_vm0, %v646_v51, 0.0 }
 0x798   :  { %651 = vadd.xlane.f32.xlu2 %v650_v52 }
 0x803   :  { %v649_v53 = vpop.xlane.xlu2 %648 }
 0x804   :  { %v653_v54 = vmul.f32 %v649_v53, %v1806_v10 }
 0x806   :  { %v655_v55 = vsub.f32 %v645_v45, %v653_v54 }
 0x808   :  { %v657_v56 = vmul.f32 %v655_v55, %v655_v55 }
 0x80a   :  { %v659_v57 = vsel %vm28_vm0, %v657_v56, 0.0 }
 0x80b   :  { %660 = vadd.xlane.f32.xlu2 %v659_v57  ;;  %v652_v58 = vpop.xlane.xlu2 %651 }
 0x80c   :  { %v654_v59 = vmul.f32 %v652_v58, %v1806_v10 }
 0x80e   :  { %v656_v60 = vsub.f32 %v646_v51, %v654_v59 }
 0x810   :  { %v658_v62 = vmul.f32 %v656_v60, %v656_v60 }
 0x812   :  { %v662_v63 = vsel %vm28_vm0, %v658_v62, 0.0 }
 0x813   :  { %663 = vadd.xlane.f32.xlu1 %v662_v63 }
 0x87e   :  { %v661_v1 = vpop.xlane.xlu2 %660 }
 0x87f   :  { %v665_v2 = vmul.f32 %v661_v1, %v1806_v10 }
 0x881   :  { %v667_v5 = vadd.f32 1e-12, %v665_v2 }
 0x883   :  { %1696 = vrsqrt.f32 %v667_v5  ;;  %vm675_vm4 = vweird.f32 %v667_v5 }
 0x886   :  { %v664_v4 = vpop.xlane.xlu1 %663 }
 0x887   :  { %v666_v6 = vmul.f32 %v664_v4, %v1806_v10 }
 0x889   :  { %v1697_v7 = vpop.eup %1696  ;;  %v668_v8 = vadd.f32 1e-12, %v666_v6 }
 0x88a   :  { %v670_v9 = vmul.f32 %v1697_v7, %v667_v5  ;;  %vm676_vm3 = vweird.f32 %v1697_v7 }
 0x88b   :  { %1698 = vrsqrt.f32 %v668_v8  ;;  %vm677_vm5 = vmor %vm675_vm4, %vm676_vm3  ;;  %vm685_vm7 = vweird.f32 %v668_v8 }
 0x88c   :  { %v671_v12 = vmul.f32 %v1697_v7, %v670_v9 }
 0x88e   :  { %v672_v13 = vmul.f32 0.5, %v671_v12 }
 0x890   :  { %v673_v14 = vsub.f32 1.5, %v672_v13 }
 0x891   :  { %v1699_v15 = vpop.eup %1698 }
 0x892   :  { %v674_v17 = vmul.f32 %v1697_v7, %v673_v14  ;;  %v680_v18 = vmul.f32 %v1699_v15, %v668_v8  ;;  %vm686_vm6 = vweird.f32 %v1699_v15 }
 0x893   :  { %vm687_vm11 = vmor %vm685_vm7, %vm686_vm6  ;;  %vm1373_vm6 = vcmask 785408  }
 0x894   :  { %v681_v19 = vmul.f32 %v1699_v15, %v680_v18  ;;  %v678_v20 = vsel %vm677_vm5, %v1697_v7, %v674_v17 }
 0x895   :  { %v689_v24 = vmul.f32 %v678_v20, %v655_v55 }
 0x896   :  { %v682_v21 = vmul.f32 0.5, %v681_v19 }
 0x897   :  { %v692_v28 = vmul.f32 %v1638_v23, %v689_v24 }
 0x898   :  { %v683_v22 = vsub.f32 1.5, %v682_v21 }
 0x899   :  { %v2000_v31 = vadd.f32 %v1639_v27, %v692_v28 }
 0x89a   :  { %v684_v25 = vmul.f32 %v1699_v15, %v683_v22 }
 0x89c   :  { %v688_v26 = vsel %vm687_vm11, %v1699_v15, %v684_v25 }
 0x89d   :  { %v690_v29 = vmul.f32 %v688_v26, %v656_v60 }
 0x89f   :  { %v693_v30 = vmul.f32 %v1638_v23, %v690_v29 }
 0x8a1   :  { %v2002_v32 = vadd.f32 %v1639_v27, %v693_v30 }
 0x8a3   :  { %v727_v33 = vpack.c.bf16 %v2002_v32, %v2000_v31 }
 0x8a5   :  { %1489 = vmatmul.msk.bf16.vlgmr.msrb.gmra.mxu2 %vm28_vm0, %v727_v33 }
 0x928   :  { %v753_v34 = vpop.f32.mrf.mxu2 }
 0x929   :  { %v754_v36 = vadd.f32 %v1640_v35, %v753_v34 }
 0x92b   :  { %v758_v38 = vpack.c.bf16 %v754_v36, %v754_v36 }
 0x92d   :  { %v762_v40 = vunpack.c.l.b16 %v758_v38 }
 0x930   :  { %v755_v37 = vpop.f32.mrf.mxu2 }
 0x931   :  { %v756_v39 = vadd.f32 %v1640_v35, %v755_v37 }
 0x933   :  { %v759_v61 = vpack.c.bf16 %v756_v39, %v756_v39 }
 0x935   :  { %v763_v41 = vunpack.c.l.b16 %v759_v61 }
 0x937   :  { %v2010_v49 = vpack.c.b16 %v763_v41, %v762_v40 }
 0x939   :  { %765 = vrot.lane.b32.xlu1 %v2010_v49, %s1751_s12  ;;  %834 = vrot.lane.b32.xlu0 %v2010_v49, %s1750_s11 }
 0x93a   :  { %836 = vrot.lane.b32.xlu2 %v2010_v49, %s1752_s13 }
 0x941   :  { %907 = vrot.lane.b32.xlu1 %v2010_v49, %s1754_s15  ;;  %978 = vrot.lane.b32.xlu0 %v2010_v49, %s1749_s10 }
 0x942   :  { %976 = vrot.lane.b32.xlu2 %v2010_v49, %s1753_s14 }
 0x949   :  { %905 = vrot.lane.b32.xlu0 %v2010_v49, %s1755_s16 }
 0x994   :  { %v837_v42 = vpop.permute.xlu2 %836 }
 0x995   :  { %v842_v43 = vsel %vm156_vm8, %v837_v42, 0 }
 0x996   :  { %851 = vmatpush.bf16.xpose.msrb.mxu3 %v842_v43 }
 0x99c   :  { %v977_v52 = vpop.permute.xlu2 %976 }
 0x9ab   :  { %v766_v44 = vpop.permute.xlu1 %765  ;;  %v835_v50 = vpop.permute.xlu0 %834 }
 0x9ac   :  { %v771_v45 = vsel %vm156_vm8, %v766_v44, 0  ;;  %1492 = vmatmul.msk.bf16.vlgmr.msrb.gmra.mxu3 %vm156_vm8, %v835_v50 }
 0x9ad   :  { %780 = vmatpush.bf16.xpose.msrb.mxu0 %v771_v45 }
 0x9b3   :  { %v908_v46 = vpop.permute.xlu1 %907  ;;  %v979_v47 = vpop.permute.xlu0 %978 }
 0x9b4   :  { %v913_v48 = vsel %vm156_vm8, %v908_v46, 0  ;;  %v984_v51 = vsel %vm156_vm8, %v979_v47, 0  ;;  %1490 = vmatmul.msk.bf16.vlgmr.msrb.gmra.mxu0 %vm156_vm8, %v2010_v49 }
 0x9b5   :  { %922 = vmatpush.bf16.xpose.msra.mxu0 %v913_v48  ;;  %993 = vmatpush.bf16.xpose.msra.mxu3 %v984_v51 }
 0x9bb   :  { %v906_v53 = vpop.permute.xlu0 %905 }
 0x9bc   :  { %1496 = vmatmul.msk.bf16.vlgmr.msra.gmra.mxu3 %vm156_vm8, %v977_v52 }
 0x9c4   :  { %1494 = vmatmul.msk.bf16.vlgmr.msra.gmra.mxu0 %vm156_vm8, %v906_v53 }
 0xa2f   :  { %v853_v54 = vpop.f32.mrf.mxu3 }
 0xa30   :  { %v858_v55 = vmul.f32 0.35355338, %v853_v54 }
 0xa31   :  { %v782_v56 = vpop.f32.mrf.mxu0 }
 0xa32   :  { %v787_v57 = vmul.f32 0.35355338, %v782_v56  ;;  %v860_v58 = vadd.f32 %v858_v55, %v1864_v11 }
 0xa34   :  { %v862_v59 = vsel %vm181_vm9, %v860_v58, -inf  ;;  %v789_v60 = vadd.f32 %v787_v57, %v1864_v11 }
 0xa35   :  { %863 = vmax.xlane.f32.xlu2 %v862_v59 }
 0xa36   :  { %v791_v62 = vsel %vm181_vm9, %v789_v60, -inf }
 0xa37   :  { %792 = vmax.xlane.f32.xlu0 %v791_v62  ;;  %v855_v63 = vpop.f32.mrf.mxu3 }
 0xa38   :  { %v859_v0 = vmul.f32 0.35355338, %v855_v63 }
 0xa39   :  { %v784_v1 = vpop.f32.mrf.mxu0 }
 0xa3a   :  { %v788_v2 = vmul.f32 0.35355338, %v784_v1  ;;  %v861_v3 = vadd.f32 %v859_v0, %v1871_v16 }
 0xa3c   :  { %v865_v5 = vsel %vm181_vm9, %v861_v3, -inf  ;;  %v790_v4 = vadd.f32 %v788_v2, %v1871_v16 }
 0xa3d   :  { %866 = vmax.xlane.f32.xlu1 %v865_v5 }
 0xa3e   :  { %v794_v6 = vsel %vm181_vm9, %v790_v4, -inf }
 0xa3f   :  { %795 = vmax.xlane.f32.xlu2 %v794_v6  ;;  %v995_v7 = vpop.f32.mrf.mxu3 }
 0xa40   :  { %v1000_v8 = vmul.f32 0.35355338, %v995_v7 }
 0xa41   :  { %v924_v9 = vpop.f32.mrf.mxu0 }
 0xa42   :  { %v929_v12 = vmul.f32 0.35355338, %v924_v9  ;;  %v1002_v13 = vadd.f32 %v1000_v8, %v1864_v11 }
 0xa44   :  { %v1004_v14 = vsel %vm181_vm9, %v1002_v13, -inf  ;;  %v931_v15 = vadd.f32 %v929_v12, %v1864_v11 }
 0xa45   :  { %1005 = vmax.xlane.f32.xlu1 %v1004_v14 }
 0xa46   :  { %v933_v17 = vsel %vm181_vm9, %v931_v15, -inf }
 0xa47   :  { %934 = vmax.xlane.f32.xlu2 %v933_v17  ;;  %v997_v18 = vpop.f32.mrf.mxu3 }
 0xa48   :  { %v1001_v19 = vmul.f32 0.35355338, %v997_v18 }
 0xa49   :  { %v926_v20 = vpop.f32.mrf.mxu0 }
 0xa4a   :  { %v930_v21 = vmul.f32 0.35355338, %v926_v20  ;;  %v1003_v22 = vadd.f32 %v1001_v19, %v1871_v16 }
 0xa4c   :  { %v1007_v23 = vsel %vm181_vm9, %v1003_v22, -inf  ;;  %v932_v24 = vadd.f32 %v930_v21, %v1871_v16 }
 0xa4d   :  { %1008 = vmax.xlane.f32.xlu0 %v1007_v23 }
 0xa4e   :  { %v936_v25 = vsel %vm181_vm9, %v932_v24, -inf }
 0xa4f   :  { %937 = vmax.xlane.f32.xlu1 %v936_v25 }
 0xaa8   :  { %v864_v26 = vpop.xlane.xlu2 %863 }
 0xaa9   :  { %v868_v11 = vsub.f32 %v860_v58, %v864_v26 }
 0xaaa   :  { %v793_v27 = vpop.xlane.xlu0 %792 }
 0xaab   :  { %v870_v28 = vmul.f32 1.442695, %v868_v11  ;;  %v797_v29 = vsub.f32 %v789_v60, %v793_v27 }
 0xaad   :  { %1700 = vpow2.f32 %v870_v28  ;;  %v799_v30 = vmul.f32 1.442695, %v797_v29 }
 0xaaf   :  { %1702 = vpow2.f32 %v799_v30 }
 0xab0   :  { %v867_v33 = vpop.xlane.xlu1 %866 }
 0xab1   :  { %v869_v34 = vsub.f32 %v861_v3, %v867_v33 }
 0xab2   :  { %v796_v35 = vpop.xlane.xlu2 %795 }
 0xab3   :  { %v1701_v36 = vpop.eup %1700  ;;  %v872_v37 = vmul.f32 1.442695, %v869_v34  ;;  %v798_v38 = vsub.f32 %v790_v4, %v796_v35 }
 0xab4   :  { %v874_v16 = vsel %vm181_vm9, %v1701_v36, 0.0 }
 0xab5   :  { %v2052_v39 = vpop.eup %1702  ;;  %1704 = vpow2.f32 %v872_v37  ;;  %v801_v61 = vmul.f32 1.442695, %v798_v38  ;;  %875 = vadd.xlane.f32.xlu0 %v874_v16 }
 0xab6   :  { %v803_v40 = vsel %vm181_vm9, %v2052_v39, 0.0 }
 0xab7   :  { %1706 = vpow2.f32 %v801_v61  ;;  %804 = vadd.xlane.f32.xlu1 %v803_v40 }
 0xab8   :  { %v1006_v41 = vpop.xlane.xlu1 %1005 }
 0xab9   :  { %v1010_v46 = vsub.f32 %v1002_v13, %v1006_v41 }
 0xaba   :  { %v935_v42 = vpop.xlane.xlu2 %934 }
 0xabb   :  { %v1705_v43 = vpop.eup %1704  ;;  %v939_v44 = vsub.f32 %v931_v15, %v935_v42  ;;  %v1012_v51 = vmul.f32 1.442695, %v1010_v46  ;;  %v1572_v46 = vld [vmem:[%s2211_s2 + $0x68] sm:$0xff] }
 0xabc   :  { %v877_v50 = vsel %vm181_vm9, %v1705_v43, 0.0  ;;  %1100 = vmatpush.bf16.msrb.mxu0 %v1572_v46 }
 0xabd   :  { %v1707_v45 = vpop.eup %1706  ;;  %v941_v47 = vmul.f32 1.442695, %v939_v44  ;;  %878 = vadd.xlane.f32.xlu2 %v877_v50 }
 0xabe   :  { %v806_v48 = vsel %vm181_vm9, %v1707_v45, 0.0 }
 0xabf   :  { %1708 = vpow2.f32 %v941_v47  ;;  %807 = vadd.xlane.f32.xlu0 %v806_v48  ;;  %v1571_v47 = vld [vmem:[%s2211_s2 + $0x60] sm:$0xff] }
 0xac0   :  { %v1009_v52 = vpop.xlane.xlu0 %1008  ;;  %1710 = vpow2.f32 %v1012_v51  ;;  %1101 = vmatpush.bf16.msrb.mxu0 %v1571_v47 }
 0xac1   :  { %v1011_v54 = vsub.f32 %v1003_v22, %v1009_v52 }
 0xac2   :  { %v938_v62 = vpop.xlane.xlu1 %937 }
 0xac3   :  { %v1014_v56 = vmul.f32 1.442695, %v1011_v54  ;;  %v940_v63 = vsub.f32 %v932_v24, %v938_v62 }
 0xac5   :  { %v2058_v53 = vpop.eup %1708  ;;  %1712 = vpow2.f32 %v1014_v56  ;;  %v943_v0 = vmul.f32 1.442695, %v940_v63 }
 0xac6   :  { %v945_v55 = vsel %vm181_vm9, %v2058_v53, 0.0  ;;  %v1711_v57 = vpop.eup %1710 }
 0xac7   :  { %946 = vadd.xlane.f32.xlu0 %v945_v55  ;;  %v1016_v58 = vsel %vm181_vm9, %v1711_v57, 0.0  ;;  %1714 = vpow2.f32 %v943_v0 }
 0xacb   :  { %v1713_v59 = vpop.eup %1712 }
 0xacc   :  { %v1019_v60 = vsel %vm181_vm9, %v1713_v59, 0.0 }
 0xacd   :  { %v1715_v1 = vpop.eup %1714 }
 0xace   :  { %v948_v2 = vsel %vm181_vm9, %v1715_v1, 0.0 }
 0xacf   :  { %1017 = vadd.xlane.f32.xlu0 %v1016_v58 }
 0xad0   :  { %814 = vrot.lane.b32.xlu1 %v2010_v49, %s1756_s1 }
 0xad5   :  { %885 = vrot.lane.b32.xlu2 %v2010_v49, %s1757_s21 }
 0xad7   :  { %1020 = vadd.xlane.f32.xlu0 %v1019_v60 }
 0xad8   :  { %956 = vrot.lane.b32.xlu1 %v2010_v49, %s1759_s23 }
 0xaeb   :  { %1027 = vrot.lane.b32.xlu0 %v2010_v49, %s1758_s22 }
 0xafe   :  { %949 = vadd.xlane.f32.xlu2 %v948_v2 }
 0xb28   :  { %v876_v3 = vpop.xlane.xlu0 %875 }
 0xb29   :  { %1716 = vrcp.f32 %v876_v3  ;;  %v1641_v3 = vld [vmem:[%s2210_s3 + $0x9] ss:$0 sm:$0xff] }
 0xb2a   :  { %v805_v7 = vpop.xlane.xlu1 %804 }
 0xb2f   :  { %v1717_v6 = vpop.eup %1716 }
 0xb30   :  { %v879_v5 = vpop.xlane.xlu2 %878  ;;  %v882_v9 = vmul.f32 %v1717_v6, %v1701_v36 }
 0xb31   :  { %1718 = vrcp.f32 %v879_v5 }
 0xb32   :  { %v808_v4 = vpop.xlane.xlu0 %807 }
 0xb33   :  { %1720 = vrcp.f32 %v808_v4 }
 0xb34   :  { %1722 = vrcp.f32 %v805_v7 }
 0xb37   :  { %v1719_v8 = vpop.eup %1718 }
 0xb38   :  { %v883_v12 = vmul.f32 %v1719_v8, %v1705_v43  ;;  %v886_v13 = vpop.permute.xlu2 %885 }
 0xb39   :  { %898 = vmatpush.bf16.msra.mxu2 %v886_v13  ;;  %v1721_v15 = vpop.eup %1720 }
 0xb3a   :  { %v884_v49 = vpack.c.bf16 %v883_v12, %v882_v9  ;;  %v947_v14 = vpop.xlane.xlu0 %946  ;;  %v1723_v17 = vpop.eup %1722  ;;  %v812_v18 = vmul.f32 %v1721_v15, %v1707_v45 }
 0xb3b   :  { %v811_v19 = vmul.f32 %v1723_v17, %v2052_v39 }
 0xb3c   :  { %1493 = vmatmul.msk.bf16.vlgmr.msra.gmra.mxu2 %vm181_vm9, %v884_v49 }
 0xb3d   :  { %v813_v21 = vpack.c.bf16 %v812_v18, %v811_v19 }
 0xb42   :  { %v815_v20 = vpop.permute.xlu1 %814  ;;  %v1018_v22 = vpop.xlane.xlu0 %1017 }
 0xb43   :  { %827 = vmatpush.bf16.msrb.mxu1 %v815_v20 }
 0xb46   :  { %1491 = vmatmul.msk.bf16.vlgmr.msrb.gmra.mxu1 %vm181_vm9, %v813_v21 }
 0xb4a   :  { %v957_v23 = vpop.permute.xlu1 %956  ;;  %v1021_v24 = vpop.xlane.xlu0 %1020 }
 0xb4b   :  { %969 = vmatpush.bf16.msra.mxu1 %v957_v23  ;;  %1724 = vrcp.f32 %v1021_v24 }
 0xb4c   :  { %1726 = vrcp.f32 %v1018_v22 }
 0xb4d   :  { %1728 = vrcp.f32 %v947_v14 }
 0xb51   :  { %v1725_v25 = vpop.eup %1724 }
 0xb52   :  { %v1727_v26 = vpop.eup %1726  ;;  %v1025_v11 = vmul.f32 %v1725_v25, %v1713_v59 }
 0xb53   :  { %v1024_v27 = vmul.f32 %v1727_v26, %v1711_v57  ;;  %v1729_v33 = vpop.eup %1728  ;;  %v1573_v26 = vld [vmem:[%s2211_s2 + $0x70] sm:$0xff] }
 0xb54   :  { %v953_v35 = vmul.f32 %v1729_v33, %v2058_v53 }
 0xb55   :  { %v1026_v29 = vpack.c.bf16 %v1025_v11, %v1024_v27 }
 0xb5d   :  { %v1028_v28 = vpop.permute.xlu0 %1027 }
 0xb5e   :  { %1040 = vmatpush.bf16.msrb.mxu2 %v1028_v28 }
 0xb61   :  { %1497 = vmatmul.msk.bf16.vlgmr.msrb.gmra.mxu2 %vm181_vm9, %v1026_v29 }
 0xb71   :  { %v950_v30 = vpop.xlane.xlu2 %949 }
 0xb72   :  { %1730 = vrcp.f32 %v950_v30 }
 0xb78   :  { %v1731_v34 = vpop.eup %1730 }
 0xb79   :  { %v954_v36 = vmul.f32 %v1731_v34, %v1715_v1 }
 0xb7b   :  { %v955_v37 = vpack.c.bf16 %v954_v36, %v953_v35 }
 0xb7d   :  { %1495 = vmatmul.msk.bf16.vlgmr.msra.gmra.mxu1 %vm181_vm9, %v955_v37 }
 0xbbf   :  { %v900_v38 = vpop.f32.mrf.mxu2 }
 0xbc3   :  { %v829_v40 = vpop.f32.mrf.mxu1 }
 0xbc7   :  { %v902_v16 = vpop.f32.mrf.mxu2 }
 0xbc8   :  { %v1615_v39 = vpack.i.bf16 %v902_v16, %v900_v38 }
 0xbca   :  { %1616 = vrot.lane.b32.xlu1 %v1615_v39, %s1760_s24 }
 0xbcb   :  { %v831_v43 = vpop.f32.mrf.mxu1 }
 0xbe4   :  { %v1042_v61 = vpop.f32.mrf.mxu2 }
 0xbec   :  { %v1044_v41 = vpop.f32.mrf.mxu2 }
 0xbed   :  { %v1625_v42 = vpack.i.bf16 %v1044_v41, %v1042_v61  ;;  %v1642_v41 = vld [vmem:[%s2210_s3 + $0xa] ss:$0 sm:$0xff] }
 0xbef   :  { %1626 = vrot.lane.b32.xlu0 %v1625_v42, %s1761_s0 }
 0xbfa   :  { %v971_v44 = vpop.f32.mrf.mxu1 }
 0xc02   :  { %v973_v50 = vpop.f32.mrf.mxu1 }
 0xc03   :  { %v1620_v45 = vpack.i.bf16 %v973_v50, %v971_v44  ;;  %v1643_v50 = vld [vmem:[%s2210_s3 + $0xb] ss:$0 sm:$0xff] }
 0xc05   :  { %1621 = vrot.lane.b32.xlu1 %v1620_v45, %s1762_s25 }
 0xc3c   :  { %v1617_v48 = vpop.permute.xlu1 %1616 }
 0xc3d   :  { %v1619_v51 = vunpack.i.h.bf16 %v1617_v48  ;;  %v1618_v52 = vunpack.i.l.bf16 %v1617_v48 }
 0xc3f   :  { %v1072_v57 = vsel %vm156_vm8, %v831_v43, %v1619_v51  ;;  %v1071_v58 = vsel %vm156_vm8, %v829_v40, %v1618_v52 }
 0xc61   :  { %v1627_v53 = vpop.permute.xlu0 %1626 }
 0xc62   :  { %v1629_v59 = vunpack.i.h.bf16 %v1627_v53  ;;  %v1628_v60 = vunpack.i.l.bf16 %v1627_v53  ;;  %v1578_v53 = vld [vmem:[%s2211_s2 + $0x98] sm:$0xff] }
 0xc63   :  { %1242 = vmatpush.bf16.msrb.mxu3 %v1578_v53 }
 0xc77   :  { %v1622_v54 = vpop.permute.xlu1 %1621 }
 0xc78   :  { %v1624_v55 = vunpack.i.h.bf16 %v1622_v54  ;;  %v1623_v56 = vunpack.i.l.bf16 %v1622_v54  ;;  %v1577_v54 = vld [vmem:[%s2211_s2 + $0x90] sm:$0xff] }
 0xc79   :  { %1243 = vmatpush.bf16.msrb.mxu3 %v1577_v54  ;;  %v1544_v54 = vld [vmem:[%s2213_s4] sm:$0xf] }
 0xc7a   :  { %v1074_v62 = vsel %vm181_vm9, %v1072_v57, %v1624_v55  ;;  %v1073_v63 = vsel %vm181_vm9, %v1071_v58, %v1623_v56  ;;  %v1576_v55 = vld [vmem:[%s2211_s2 + $0x88] sm:$0xff]  ;;  %v1575_v56 = vld [vmem:[%s2211_s2 + $0x80] sm:$0xff] }
 0xc7b   :  { %v1076_v0 = vsel %vm466_vm10, %v1074_v62, %v1629_v59  ;;  %v1075_v1 = vsel %vm466_vm10, %v1073_v63, %v1628_v60  ;;  %v1644_v57 = vld [vmem:[%s2210_s3 + $0xc] ss:$0 sm:$0xff] }
 0xc7c   :  { %v1077_v2 = vpack.c.bf16 %v1076_v0, %v1075_v1 }
 0xc7d   :  { %1244 = vmatpush.bf16.msrb.mxu3 %v1576_v55  ;;  %v1582_v55 = vld [vmem:[%s2213_s4 + $0x4] sm:$0xf0] }
 0xc7e   :  { %1506 = vmatmul.msk.bf16.vlgmr.msrb.gmra.mxu0 %vm28_vm0, %v1077_v2 }
 0xc81   :  { %1245 = vmatpush.bf16.msrb.mxu3 %v1575_v56  ;;  %v1545_v56 = vor.u32 %v1582_v55, %v1544_v54 }
 0xcfb   :  { %v1103_v5 = vpop.f32.mrf.mxu0 }
 0xcfc   :  { %v1104_v4 = vadd.f32 %v1641_v3, %v1103_v5 }
 0xcfe   :  { %v1108_v6 = vadd.f32 %v1104_v4, %v2000_v31 }
 0xd00   :  { %v1110_v7 = vsel %vm28_vm0, %v1108_v6, 0.0 }
 0xd01   :  { %1111 = vadd.xlane.f32.xlu1 %v1110_v7 }
 0xd03   :  { %v1105_v8 = vpop.f32.mrf.mxu0 }
 0xd04   :  { %v1106_v9 = vadd.f32 %v1641_v3, %v1105_v8 }
 0xd06   :  { %v1109_v12 = vadd.f32 %v1106_v9, %v2002_v32  ;;  %v1574_v32 = vld [vmem:[%s2211_s2 + $0x78] sm:$0xff] }
 0xd07   :  { %1183 = vmatpush.bf16.msrb.mxu1 %v1574_v32 }
 0xd08   :  { %v1113_v13 = vsel %vm28_vm0, %v1109_v12, 0.0 }
 0xd09   :  { %1114 = vadd.xlane.f32.xlu0 %v1113_v13 }
 0xd0b   :  { %1184 = vmatpush.bf16.msrb.mxu1 %v1573_v26 }
 0xd74   :  { %v1112_v49 = vpop.xlane.xlu1 %1111 }
 0xd75   :  { %v1116_v14 = vmul.f32 %v1112_v49, %v1806_v10 }
 0xd77   :  { %v1118_v15 = vsub.f32 %v1108_v6, %v1116_v14 }
 0xd79   :  { %v1120_v17 = vmul.f32 %v1118_v15, %v1118_v15 }
 0xd7b   :  { %v1122_v18 = vsel %vm28_vm0, %v1120_v17, 0.0 }
 0xd7c   :  { %v1115_v19 = vpop.xlane.xlu0 %1114  ;;  %1123 = vadd.xlane.f32.xlu2 %v1122_v18 }
 0xd7d   :  { %v1117_v31 = vmul.f32 %v1115_v19, %v1806_v10 }
 0xd7f   :  { %v1119_v20 = vsub.f32 %v1109_v12, %v1117_v31  ;;  %v1645_v31 = vld [vmem:[%s2210_s3 + $0xd] ss:$0 sm:$0xff] }
 0xd81   :  { %v1121_v21 = vmul.f32 %v1119_v20, %v1119_v20 }
 0xd83   :  { %v1125_v22 = vsel %vm28_vm0, %v1121_v21, 0.0 }
 0xd84   :  { %1126 = vadd.xlane.f32.xlu2 %v1125_v22 }
 0xdef   :  { %v1124_v23 = vpop.xlane.xlu2 %1123 }
 0xdf0   :  { %v1128_v24 = vmul.f32 %v1124_v23, %v1806_v10 }
 0xdf2   :  { %v1130_v25 = vadd.f32 1e-12, %v1128_v24 }
 0xdf4   :  { %1732 = vrsqrt.f32 %v1130_v25  ;;  %vm1138_vm9 = vweird.f32 %v1130_v25 }
 0xdf7   :  { %v1127_v11 = vpop.xlane.xlu2 %1126 }
 0xdf8   :  { %v1129_v27 = vmul.f32 %v1127_v11, %v1806_v10 }
 0xdfa   :  { %v1733_v28 = vpop.eup %1732  ;;  %v1131_v29 = vadd.f32 1e-12, %v1129_v27 }
 0xdfb   :  { %v1133_v30 = vmul.f32 %v1733_v28, %v1130_v25  ;;  %vm1139_vm8 = vweird.f32 %v1733_v28 }
 0xdfc   :  { %1734 = vrsqrt.f32 %v1131_v29  ;;  %vm1140_vm10 = vmor %vm1138_vm9, %vm1139_vm8  ;;  %vm1148_vm13 = vweird.f32 %v1131_v29 }
 0xdfd   :  { %v1134_v33 = vmul.f32 %v1733_v28, %v1133_v30 }
 0xdff   :  { %v1135_v34 = vmul.f32 0.5, %v1134_v33 }
 0xe01   :  { %v1136_v35 = vsub.f32 1.5, %v1135_v34 }
 0xe02   :  { %v1735_v36 = vpop.eup %1734 }
 0xe03   :  { %v1137_v37 = vmul.f32 %v1733_v28, %v1136_v35  ;;  %v1143_v38 = vmul.f32 %v1735_v36, %v1131_v29  ;;  %vm1149_vm12 = vweird.f32 %v1735_v36 }
 0xe04   :  { %vm1150_vm14 = vmor %vm1148_vm13, %vm1149_vm12 }
 0xe05   :  { %v1144_v16 = vmul.f32 %v1735_v36, %v1143_v38  ;;  %v1141_v39 = vsel %vm1140_vm10, %v1733_v28, %v1137_v37  ;;  %v1539_v38 = vld [vmem:[%s2213_s4 + $0x10] sm:$0xf] }
 0xe06   :  { %v1152_v42 = vmul.f32 %v1141_v39, %v1118_v15 }
 0xe07   :  { %v1145_v61 = vmul.f32 0.5, %v1144_v16  ;;  %v1580_v16 = vld [vmem:[%s2213_s4 + $0x14] sm:$0xf0] }
 0xe08   :  { %v1155_v45 = vmul.f32 %v1642_v41, %v1152_v42  ;;  %v1540_v39 = vor.u32 %v1580_v16, %v1539_v38  ;;  %v1579_v42 = vld [vmem:[%s2213_s4 + $0x4] sm:$0xf0] }
 0xe09   :  { %v1146_v40 = vsub.f32 1.5, %v1145_v61 }
 0xe0a   :  { %v1158_v48 = vadd.f32 %v1643_v50, %v1155_v45  ;;  %1332 = vmatpush.bf16.msra.mxu2 %v1540_v39  ;;  %v1584_v45 = vld [vmem:[%s2213_s4 + $0x14] sm:$0xf0] }
 0xe0b   :  { %v1147_v43 = vmul.f32 %v1735_v36, %v1146_v40 }
 0xe0d   :  { %v1151_v44 = vsel %vm1150_vm14, %v1735_v36, %v1147_v43 }
 0xe0e   :  { %v1153_v46 = vmul.f32 %v1151_v44, %v1119_v20 }
 0xe10   :  { %v1156_v47 = vmul.f32 %v1642_v41, %v1153_v46  ;;  %v1535_v41 = vld [vmem:[%s2213_s4] sm:$0xf]  ;;  %v1583_v46 = vld [vmem:[%s2213_s4 + $0x14] sm:$0xf] }
 0xe11   :  { %v1536_v44 = vor.u32 %v1579_v42, %v1535_v41 }
 0xe12   :  { %v1159_v51 = vadd.f32 %v1643_v50, %v1156_v47  ;;  %v1552_v50 = vld [vmem:[%s2213_s4 + $0x10] sm:$0xf] }
 0xe13   :  { %1333 = vmatpush.bf16.msra.mxu2 %v1536_v44 }
 0xe14   :  { %v1160_v52 = vpack.c.bf16 %v1159_v51, %v1158_v48 }
 0xe16   :  { %1515 = vmatmul.msk.bf16.vlgmr.msrb.gmra.mxu1 %vm28_vm0, %v1160_v52 }
 0xe93   :  { %v1186_v58 = vpop.f32.mrf.mxu1 }
 0xe94   :  { %v1187_v59 = vadd.f32 %v1644_v57, %v1186_v58 }
 0xe96   :  { %v1193_v60 = vmul.f32 0.044715, %v1187_v59  ;;  %v1191_v49 = vmul.f32 0.5, %v1187_v59 }
 0xe98   :  { %v1195_v62 = vmul.f32 %v1193_v60, %v1187_v59 }
 0xe9a   :  { %v1197_v63 = vmul.f32 %v1195_v62, %v1187_v59 }
 0xe9b   :  { %v1188_v0 = vpop.f32.mrf.mxu1 }
 0xe9c   :  { %v1199_v1 = vadd.f32 %v1197_v63, %v1187_v59  ;;  %v1189_v2 = vadd.f32 %v1644_v57, %v1188_v0  ;;  %v1546_v59 = vld [vmem:[%s2213_s4 + $0x8] sm:$0xf0] }
 0xe9e   :  { %v1194_v3 = vmul.f32 0.044715, %v1189_v2  ;;  %v1201_v5 = vmul.f32 0.7978846, %v1199_v1  ;;  %v1192_v14 = vmul.f32 0.5, %v1189_v2 }
 0xea0   :  { %v1196_v4 = vmul.f32 %v1194_v3, %v1189_v2  ;;  %1736 = vtanh.f32 %v1201_v5 }
 0xea2   :  { %v1198_v6 = vmul.f32 %v1196_v4, %v1189_v2 }
 0xea4   :  { %v1200_v7 = vadd.f32 %v1198_v6, %v1189_v2 }
 0xea6   :  { %v1202_v8 = vmul.f32 0.7978846, %v1200_v7  ;;  %v1737_v9 = vpop.eup %1736 }
 0xea7   :  { %v1205_v12 = vadd.f32 1.0, %v1737_v9  ;;  %v1646_v9 = vld [vmem:[%s2210_s3 + $0xe] ss:$0 sm:$0xff] }
 0xea8   :  { %1738 = vtanh.f32 %v1202_v8 }
 0xea9   :  { %v1207_v17 = vmul.f32 %v1205_v12, %v1191_v49 }
 0xeae   :  { %v1739_v13 = vpop.eup %1738 }
 0xeaf   :  { %v1206_v15 = vadd.f32 1.0, %v1739_v13 }
 0xeb1   :  { %v1208_v18 = vmul.f32 %v1206_v15, %v1192_v14  ;;  %v1647_v14 = vld [vmem:[%s2210_s3 + $0xf] ss:$0 sm:$0xff] }
 0xeb3   :  { %v1209_v19 = vpack.c.bf16 %v1208_v18, %v1207_v17 }
 0xeb5   :  { %1532 = vmatmul.msk.bf16.vlgmr.msrb.gmra.mxu3 %vm627_vm2, %v1209_v19 }
 0xf38   :  { %v1247_v20 = vpop.f32.mrf.mxu3 }
 0xf39   :  { %v1248_v21 = vadd.f32 %v1645_v31, %v1247_v20 }
 0xf3b   :  { %v1252_v22 = vadd.f32 %v1248_v21, %v1158_v48  ;;  %v1553_v48 = vor.u32 %v1584_v45, %v1552_v50 }
 0xf3d   :  { %v1254_v32 = vsel %vm28_vm0, %v1252_v22, 0.0  ;;  %1369 = vrot.lane.b32.xlu0 %v1553_v48, %s1751_s12 }
 0xf3e   :  { %1255 = vadd.xlane.f32.xlu2 %v1254_v32 }
 0xf40   :  { %v1249_v23 = vpop.f32.mrf.mxu3 }
 0xf41   :  { %v1250_v24 = vadd.f32 %v1645_v31, %v1249_v23 }
 0xf43   :  { %v1253_v25 = vadd.f32 %v1250_v24, %v1159_v51  ;;  %v1554_v51 = vld [vmem:[%s2213_s4 + $0x18] sm:$0xf0] }
 0xf44   :  { %v1557_v53 = vor.u32 %v1583_v46, %v1554_v51 }
 0xf45   :  { %v1257_v26 = vsel %vm28_vm0, %v1253_v25, 0.0 }
 0xf46   :  { %1258 = vadd.xlane.f32.xlu2 %v1257_v26 }
 0xfaf   :  { %v1370_v21 = vpop.permute.xlu0 %1369 }
 0xfb1   :  { %v1256_v11 = vpop.xlane.xlu2 %1255 }
 0xfb2   :  { %v1260_v27 = vmul.f32 %v1256_v11, %v1806_v10  ;;  %v1648_v11 = vld [vmem:[%s2209_s5 + $0x2] ss:$0 sm:$0xff] }
 0xfb4   :  { %v1262_v28 = vsub.f32 %v1252_v22, %v1260_v27 }
 0xfb6   :  { %v1264_v29 = vmul.f32 %v1262_v28, %v1262_v28 }
 0xfb8   :  { %v1266_v30 = vsel %vm28_vm0, %v1264_v29, 0.0 }
 0xfb9   :  { %1267 = vadd.xlane.f32.xlu1 %v1266_v30  ;;  %v1259_v33 = vpop.xlane.xlu2 %1258 }
 0xfba   :  { %v1261_v34 = vmul.f32 %v1259_v33, %v1806_v10 }
 0xfbc   :  { %v1263_v35 = vsub.f32 %v1253_v25, %v1261_v34 }
 0xfbe   :  { %v1265_v36 = vmul.f32 %v1263_v35, %v1263_v35 }
 0xfc0   :  { %v1269_v37 = vsel %vm28_vm0, %v1265_v36, 0.0 }
 0xfc1   :  { %1270 = vadd.xlane.f32.xlu2 %v1269_v37 }
 0xfd2   :  { %1371 = vrot.lane.b32.xlu1 %v1557_v53, %s1751_s12 }
 0xfd9   :  { %1365 = vrot.lane.b32.xlu2 %v1545_v56, %s1751_s12 }
0x102c   :  { %v1268_v61 = vpop.xlane.xlu1 %1267 }
0x102d   :  { %v1272_v40 = vmul.f32 %v1268_v61, %v1806_v10 }
0x102f   :  { %v1274_v43 = vadd.f32 1e-12, %v1272_v40 }
0x1031   :  { %1740 = vrsqrt.f32 %v1274_v43  ;;  %vm1282_vm1 = vweird.f32 %v1274_v43 }
0x1034   :  { %v1271_v47 = vpop.xlane.xlu2 %1270 }
0x1035   :  { %v1273_v52 = vmul.f32 %v1271_v47, %v1806_v10  ;;  %v1581_v10 = vld [vmem:[%s2213_s4 + $0x4] sm:$0xf] }
0x1036   :  { %v1549_v63 = vor.u32 %v1581_v10, %v1546_v59 }
0x1037   :  { %v1741_v57 = vpop.eup %1740  ;;  %v1275_v58 = vadd.f32 1e-12, %v1273_v52 }
0x1038   :  { %v1277_v60 = vmul.f32 %v1741_v57, %v1274_v43  ;;  %1367 = vrot.lane.b32.xlu0 %v1549_v63, %s1751_s12  ;;  %vm1283_vm15 = vweird.f32 %v1741_v57 }
0x1039   :  { %1742 = vrsqrt.f32 %v1275_v58  ;;  %vm1284_vm2 = vmor %vm1282_vm1, %vm1283_vm15  ;;  %vm1292_vm4 = vweird.f32 %v1275_v58 }
0x103a   :  { %v1278_v62 = vmul.f32 %v1741_v57, %v1277_v60 }
0x103c   :  { %v1279_v0 = vmul.f32 0.5, %v1278_v62  ;;  %v1366_v24 = vpop.permute.xlu2 %1365 }
0x103e   :  { %v1280_v1 = vsub.f32 1.5, %v1279_v0 }
0x103f   :  { %v1743_v2 = vpop.eup %1742 }
0x1040   :  { %v1281_v3 = vmul.f32 %v1741_v57, %v1280_v1  ;;  %v1287_v5 = vmul.f32 %v1743_v2, %v1275_v58  ;;  %vm1293_vm3 = vweird.f32 %v1743_v2 }
0x1041   :  { %vm1294_vm5 = vmor %vm1292_vm4, %vm1293_vm3 }
0x1042   :  { %v1288_v4 = vmul.f32 %v1743_v2, %v1287_v5  ;;  %v1285_v6 = vsel %vm1284_vm2, %v1741_v57, %v1281_v3 }
0x1043   :  { %v1296_v12 = vmul.f32 %v1285_v6, %v1262_v28 }
0x1044   :  { %v1289_v7 = vmul.f32 0.5, %v1288_v4  ;;  %v1372_v22 = vpop.permute.xlu1 %1371 }
0x1045   :  { %v1299_v15 = vmul.f32 %v1646_v9, %v1296_v12  ;;  %v1375_v32 = vsel %vm1373_vm6, %v1370_v21, %v1372_v22 }
0x1046   :  { %v1290_v8 = vsub.f32 1.5, %v1289_v7  ;;  %1387 = vmatpush.bf16.msra.mxu0 %v1375_v32 }
0x1047   :  { %v1302_v19 = vadd.f32 %v1647_v14, %v1299_v15 }
0x1048   :  { %v1291_v13 = vmul.f32 %v1743_v2, %v1290_v8 }
0x104a   :  { %v1295_v49 = vsel %vm1294_vm5, %v1743_v2, %v1291_v13 }
0x104b   :  { %v1297_v17 = vmul.f32 %v1295_v49, %v1263_v35  ;;  %v1649_v35 = vld [vmem:[%s2209_s5 + $0x3] ss:$0 sm:$0xff] }
0x104d   :  { %v1300_v18 = vmul.f32 %v1646_v9, %v1297_v17 }
0x104f   :  { %v1303_v31 = vadd.f32 %v1647_v14, %v1300_v18 }
0x1051   :  { %v1308_v20 = vpack.c.bf16 %v1303_v31, %v1302_v19 }
0x1053   :  { %1541 = vmatmul.msk.bf16.vlgmr.msra.gmra.mxu2 %vm28_vm0, %v1308_v20 }
0x10aa   :  { %v1368_v23 = vpop.permute.xlu0 %1367 }
0x10ab   :  { %v1374_v25 = vsel %vm1373_vm6, %v1366_v24, %v1368_v23 }
0x10ac   :  { %1388 = vmatpush.bf16.msra.mxu0 %v1374_v25 }
0x10d6   :  { %v1335_v26 = vpop.f32.mrf.mxu2 }
0x10d7   :  { %v1336_v27 = vadd.f32 %v1648_v11, %v1335_v26 }
0x10d9   :  { %1744 = vtanh.f32 %v1336_v27 }
0x10de   :  { %v1337_v28 = vpop.f32.mrf.mxu2 }
0x10df   :  { %v1338_v29 = vadd.f32 %v1648_v11, %v1337_v28  ;;  %v1745_v30 = vpop.eup %1744 }
0x10e1   :  { %1746 = vtanh.f32 %v1338_v29 }
0x10e7   :  { %v1747_v33 = vpop.eup %1746 }
0x10e8   :  { %v1346_v34 = vpack.c.bf16 %v1747_v33, %v1745_v30 }
0x10ea   :  { %1558 = vmatmul.msk.bf16.vlgmr.msra.gmra.mxu0 %vm28_vm0, %v1346_v34 }
0x1167   :  { %v1390_v36 = vpop.f32.mrf.mxu0 }
0x1168   :  { %v1391_v37 = vadd.f32 %v1649_v35, %v1390_v36 }
0x116a   :  { %1395 = vst [vmem:[%s2214_s6] sm:$0xff] %v1391_v37 }
0x116f   :  { %v1392_v38 = vpop.f32.mrf.mxu0 }
0x1170   :  { %v1393_v16 = vadd.f32 %v1649_v35, %v1392_v38 }
0x1172   :  { %1396 = vst [vmem:[%s2214_s6 + $0x8] sm:$0xff] %v1393_v16 }

</bundles_post_ra>
